<compile_context>
chip_gen: v6e
topology: v6e:2x2x1
jax: 0.10.0
libtpu: 0.0.40
codegen_flags: <defaults>
</compile_context>

<pallas_src>
import jax
import jax.numpy as jnp
from jax import lax
from jax.experimental import pallas as pl
from jax.experimental.pallas import tpu as pltpu

EPS = 1e-6
NUM_GROUPS = 32


def _pick_chunk(hw):
    """Largest multiple-of-128 divisor of hw that is <= 1024 (and < hw, so the
    chunked path is exercised even at small sizes); falls back to hw itself."""
    for c in (1024, 896, 768, 640, 512, 384, 256, 128):
        if hw % c == 0 and c < hw:
            return c
    # hw <= 128, or hw not a multiple of 128 (e.g. 7x7 feature maps).
    # TODO(synk): non-multiple-of-128 HW makes stores masked (vst.msk) and
    # underfills lanes; pad HW in the wrapper if such shapes matter.
    return hw


def _vmem_limit_bytes():
    """Generation-aware VMEM request: ~85% of per-core capacity (≈54 MiB on
    v7x, ≈108 MiB on v5e/v6e), leaving headroom for compiler scratch."""
    try:
        cap = getattr(pltpu.get_tpu_info(), "vmem_capacity_bytes", None)
    except Exception:
        cap = None
    if not cap:
        cap = 64 * 1024 * 1024  # conservative fallback (v7x physical VMEM)
    return int(cap * 0.85)


def _make_sab_kernel(n_chunks, chunk):
    """Kernel for one batch element: x block (1, C, HW) f32."""

    def kernel(x_ref, gat_ref, sct_ref, wf_ref, bf_ref, o_ref):
        # ---- one-pass GroupNorm statistics on the resident (C, HW) block ----
        x = x_ref[0]                                          # (C, HW) f32
        s1 = jnp.sum(x, axis=1, keepdims=True)                # (C, 1)  Σx
        s2 = jnp.sum(x * x, axis=1, keepdims=True)            # (C, 1)  Σx²
        gat = gat_ref[...]                                    # (G, C)  1/(cg·HW) one-hot
        sct = sct_ref[...]                                    # (C, G)  one-hot
        g1 = jnp.dot(gat, s1, preferred_element_type=jnp.float32)    # (G,1) E[x]
        g2 = jnp.dot(gat, s2, preferred_element_type=jnp.float32)    # (G,1) E[x²]
        mean = jnp.dot(sct, g1, preferred_element_type=jnp.float32)  # (C,1)
        ex2 = jnp.dot(sct, g2, preferred_element_type=jnp.float32)   # (C,1)
        var = jnp.maximum(ex2 - mean * mean, 0.0)             # guard cancellation
        rstd = lax.rsqrt(var + EPS)                           # (C, 1)

        wf = wf_ref[...]                                      # (C, C) bf16 fused weight
        bf = bf_ref[...]                                      # (C, 1) f32 fused bias

        # ---- normalize -> fused matmul -> bias -> residual, chunked over HW --
        def body(ci, carry):
            off = ci * chunk
            if chunk % 128 == 0:
                off = pl.multiple_of(off, 128)
            xc = x_ref[0, :, pl.ds(off, chunk)]               # (C, chunk) f32
            hn = ((xc - mean) * rstd).astype(jnp.bfloat16)    # bf16 MXU input
            y = jnp.dot(wf, hn, preferred_element_type=jnp.float32)
            o_ref[0, :, pl.ds(off, chunk)] = xc + y + bf      # residual + store
            return carry

        lax.fori_loop(0, n_chunks, body, 0, unroll=True)

    return kernel


def self_attention_block(x_nchw, params):
    """x_nchw: (N, C, H, W) float32.  Returns (N, C, H, W)."""
    N, C, H, W = x_nchw.shape
    HW = H * W
    assert C % NUM_GROUPS == 0, "GroupNorm(32) requires C divisible by 32"
    G = NUM_GROUPS
    cg = C // G

    # NCHW -> (N, C, HW): pure reshape, lane axis = HW (lane-dense stores).
    x = x_nchw.reshape(N, C, HW).astype(jnp.float32)

    # Group reduce / broadcast matrices (replace the old (C,C) gmat):
    #   gather[g,c] = 1/(cg*HW) if channel c is in group g  -> group means
    #   scatter[c,g] = 1        if channel c is in group g  -> broadcast back
    grp = jnp.arange(C) // cg
    onehot = (grp[None, :] == jnp.arange(G)[:, None]).astype(jnp.float32)  # (G,C)
    gather = onehot / float(cg * HW)
    scatter = onehot.T                                                      # (C,G)

    # Fold GN affine + conv_values + [attn == identity] + conv_out into one
    # (C,C) weight + bias (the q/k projections are dead: softmax rows sum to 1).
    hp = jax.lax.Precision.HIGHEST
    wvo = jnp.dot(params["wo"], params["wv"], precision=hp)               # (C,C)
    w_fused = (wvo * params["gamma"][None, :]).astype(jnp.bfloat16)       # bf16 MXU
    b_fused = (jnp.dot(wvo, params["beta"], precision=hp)
               + jnp.dot(params["wo"], params["bv"], precision=hp)
               + params["bo"]).astype(jnp.float32).reshape(C, 1)

    chunk = _pick_chunk(HW)
    kernel = _make_sab_kernel(HW // chunk, chunk)

    def run(lean):
        """lean=True: single-buffer constants + alias x into the output."""

        def const_spec(shape):
            if lean:
                return pl.BlockSpec(shape, lambda n: (0,) * len(shape),
                                    pipeline_mode=pl.Buffered(1))
            return pl.BlockSpec(shape, lambda n: (0,) * len(shape))

        return pl.pallas_call(
            kernel,
            out_shape=jax.ShapeDtypeStruct((N, C, HW), jnp.float32),
            grid_spec=pltpu.PrefetchScalarGridSpec(
                num_scalar_prefetch=0,
                grid=(N,),
                in_specs=[
                    pl.BlockSpec((1, C, HW), lambda n: (n, 0, 0)),  # x (per batch)
                    const_spec((G, C)),                             # gather  (f32)
                    const_spec((C, G)),                             # scatter (f32)
                    const_spec((C, C)),                             # w_fused (bf16)
                    const_spec((C, 1)),                             # b_fused (f32)
                ],
                out_specs=pl.BlockSpec((1, C, HW), lambda n: (n, 0, 0)),
            ),
            compiler_params=pltpu.CompilerParams(
                dimension_semantics=("parallel",),       # batch axis -> megacore
                vmem_limit_bytes=_vmem_limit_bytes()),   # generation-aware
            input_output_aliases={0: 0} if lean else {},
        )(x, gather, scatter, w_fused, b_fused)

    try:
        out = run(lean=True)
    except Exception:
        # Conservative fallback if this build rejects Buffered(1) single
        # buffering or eager in/out aliasing; kernel body is identical.
        out = run(lean=False)

    # TODO(synk): if a single (1, C, HW) block cannot fit the generation's VMEM
    # (e.g. C=512, HW=16384 on v7x), add a second grid axis tiling HW with
    # Σx/Σx² accumulated across an "arbitrary" axis before the compute sweep
    # (costs ~1.5x HBM traffic, so only when the resident path can't fit).
    # TODO(synk): when N == 1 on v7x (2 TensorCores) the (N,) grid leaves one
    # core idle; split HW into a second "parallel" axis with precomputed stats.
    return out.reshape(N, C, H, W)


def reference_forward(x, params):
    """Pure-JAX transcription of the PyTorch forward (NCHW), full attention path."""
    N, C, H, W = x.shape
    cg = C // NUM_GROUPS
    hp = jax.lax.Precision.HIGHEST
    xg = x.reshape(N, NUM_GROUPS, cg, H, W)
    mean = xg.mean(axis=(2, 3, 4), keepdims=True)
    var = ((xg - mean) ** 2).mean(axis=(2, 3, 4), keepdims=True)
    h = ((xg - mean) / jnp.sqrt(var + EPS)).reshape(N, C, H, W)
    h = h * params["gamma"][None, :, None, None] + params["beta"][None, :, None, None]

    def conv1x1(t, w, b):
        return jnp.einsum('nchw,oc->nohw', t, w, precision=hp) + b[None, :, None, None]

    q = conv1x1(h, params["wq"], params["bq"])
    k = conv1x1(h, params["wk"], params["bk"])
    v = conv1x1(h, params["wv"], params["bv"])
    qf = q.reshape(N, C, H * W); kf = k.reshape(N, C, H * W); vf = v.reshape(N, C, H * W)
    wqk = jnp.einsum('ncq,nck->nqk', qf, kf, precision=hp) * (float(C) ** -0.5)
    wqk = jax.nn.softmax(wqk, axis=2)
    attn = jnp.einsum('ncq,nqk->ncq', vf, wqk, precision=hp).reshape(N, C, H, W)
    out = conv1x1(attn, params["wo"], params["bo"])
    return x + out


def make_params(key, C):
    ks = jax.random.split(key, 8)
    s = 0.1
    return {
        "gamma": jnp.ones((C,), jnp.float32),
        "beta": jnp.zeros((C,), jnp.float32),
        "wq": s * jax.random.normal(ks[0], (C, C), jnp.float32),
        "bq": s * jax.random.normal(ks[1], (C,), jnp.float32),
        "wk": s * jax.random.normal(ks[2], (C, C), jnp.float32),
        "bk": s * jax.random.normal(ks[3], (C,), jnp.float32),
        "wv": s * jax.random.normal(ks[4], (C, C), jnp.float32),
        "bv": s * jax.random.normal(ks[5], (C,), jnp.float32),
        "wo": s * jax.random.normal(ks[6], (C, C), jnp.float32),
        "bo": s * jax.random.normal(ks[7], (C,), jnp.float32),
    }


if __name__ == "__main__":
    key = jax.random.PRNGKey(0)
    kx, kp = jax.random.split(key)
    N, C, H, W = 2, 32, 16, 16        # C=32 -> smallest valid for GroupNorm(32)
    x = jax.random.normal(kx, (N, C, H, W), jnp.float32)
    params = make_params(kp, C)

    y = jax.block_until_ready(self_attention_block(x, params))
    y_ref = reference_forward(x, params)

    assert y.shape == (N, C, H, W)
    max_err = float(jnp.max(jnp.abs(y - y_ref)))
    # bf16 MXU inputs (f32 accumulation) -> a few-1e-3 tolerance vs f32 reference.
    assert jnp.allclose(y, y_ref, rtol=5e-3, atol=5e-3), max_err
    print("KERNEL_OK")
</pallas_src>

<mosaic_0001>
module attributes {stable_mosaic.version = 11 : i64} {
  func.func @kernel(%arg0: i32, %arg1: memref<1x32x256xf32, #tpu.memory_space<vmem>>, %arg2: memref<32x32xf32, #tpu.memory_space<vmem>>, %arg3: memref<32x32xf32, #tpu.memory_space<vmem>>, %arg4: memref<32x32xbf16, #tpu.memory_space<vmem>>, %arg5: memref<32x1xf32, #tpu.memory_space<vmem>>, %arg6: memref<1x32x256xf32, #tpu.memory_space<vmem>>) attributes {dimension_semantics = [#tpu.dimension_semantics<parallel>], iteration_bounds = array<i64: 2>, scalar_prefetch = 0 : i64, scratch_operands = 0 : i64, tpu.core_type = #tpu.core_type<tc>, window_params = [{transform_indices = @transform_0, window_bounds = array<i64: 1, 32, 256>}, {pipeline_mode = #tpu.pipeline_mode<synchronous>, transform_indices = @transform_1, window_bounds = array<i64: 32, 32>}, {pipeline_mode = #tpu.pipeline_mode<synchronous>, transform_indices = @transform_2, window_bounds = array<i64: 32, 32>}, {pipeline_mode = #tpu.pipeline_mode<synchronous>, transform_indices = @transform_3, window_bounds = array<i64: 32, 32>}, {pipeline_mode = #tpu.pipeline_mode<synchronous>, transform_indices = @transform_4, window_bounds = array<i64: 32, 1>}, {transform_indices = @transform_5, window_bounds = array<i64: 1, 32, 256>}]} {
    %c0 = arith.constant 0 : index
    %c0_0 = arith.constant 0 : index
    %c0_1 = arith.constant 0 : index
    %0 = vector.load %arg1[%c0, %c0_0, %c0_1] : memref<1x32x256xf32, #tpu.memory_space<vmem>>, vector<1x32x256xf32>
    %1 = vector.shape_cast %0 : vector<1x32x256xf32> to vector<32x256xf32>
    %cst = arith.constant dense<0.000000e+00> : vector<32xf32>
    %2 = vector.multi_reduction <add>, %1, %cst [1] : vector<32x256xf32> to vector<32xf32>
    %3 = vector.shape_cast %2 : vector<32xf32> to vector<32x1xf32>
    %4 = arith.mulf %1, %1 : vector<32x256xf32>
    %cst_2 = arith.constant dense<0.000000e+00> : vector<32xf32>
    %5 = vector.multi_reduction <add>, %4, %cst_2 [1] : vector<32x256xf32> to vector<32xf32>
    %6 = vector.shape_cast %5 : vector<32xf32> to vector<32x1xf32>
    %c0_3 = arith.constant 0 : index
    %c0_4 = arith.constant 0 : index
    %7 = vector.load %arg2[%c0_3, %c0_4] : memref<32x32xf32, #tpu.memory_space<vmem>>, vector<32x32xf32>
    %c0_5 = arith.constant 0 : index
    %c0_6 = arith.constant 0 : index
    %8 = vector.load %arg3[%c0_5, %c0_6] : memref<32x32xf32, #tpu.memory_space<vmem>>, vector<32x32xf32>
    %cst_7 = arith.constant dense<0.000000e+00> : vector<32x1xf32>
    %9 = tpu.matmul %7, %3, %cst_7 {dimension_numbers = #tpu.dot_dimension_numbers<[1], [0], [0], [1], [0, 0, 1, 1], [], []>} : vector<32x32xf32>, vector<32x1xf32>, vector<32x1xf32> -> vector<32x1xf32>
    %cst_8 = arith.constant dense<0.000000e+00> : vector<32x1xf32>
    %10 = tpu.matmul %7, %6, %cst_8 {dimension_numbers = #tpu.dot_dimension_numbers<[1], [0], [0], [1], [0, 0, 1, 1], [], []>} : vector<32x32xf32>, vector<32x1xf32>, vector<32x1xf32> -> vector<32x1xf32>
    %cst_9 = arith.constant dense<0.000000e+00> : vector<32x1xf32>
    %11 = tpu.matmul %8, %9, %cst_9 {dimension_numbers = #tpu.dot_dimension_numbers<[1], [0], [0], [1], [0, 0, 1, 1], [], []>} : vector<32x32xf32>, vector<32x1xf32>, vector<32x1xf32> -> vector<32x1xf32>
    %cst_10 = arith.constant dense<0.000000e+00> : vector<32x1xf32>
    %12 = tpu.matmul %8, %10, %cst_10 {dimension_numbers = #tpu.dot_dimension_numbers<[1], [0], [0], [1], [0, 0, 1, 1], [], []>} : vector<32x32xf32>, vector<32x1xf32>, vector<32x1xf32> -> vector<32x1xf32>
    %13 = arith.mulf %11, %11 : vector<32x1xf32>
    %14 = arith.subf %12, %13 : vector<32x1xf32>
    %cst_11 = arith.constant 0.000000e+00 : f32
    %15 = vector.broadcast %cst_11 : f32 to vector<32x1xf32>
    %16 = arith.maximumf %14, %15 : vector<32x1xf32>
    %cst_12 = arith.constant 9.99999997E-7 : f32
    %17 = vector.broadcast %cst_12 : f32 to vector<32x1xf32>
    %18 = arith.addf %16, %17 : vector<32x1xf32>
    %19 = math.rsqrt %18 : vector<32x1xf32>
    %c0_13 = arith.constant 0 : index
    %c0_14 = arith.constant 0 : index
    %20 = vector.load %arg4[%c0_13, %c0_14] : memref<32x32xbf16, #tpu.memory_space<vmem>>, vector<32x32xbf16>
    %c0_15 = arith.constant 0 : index
    %c0_16 = arith.constant 0 : index
    %21 = vector.load %arg5[%c0_15, %c0_16] : memref<32x1xf32, #tpu.memory_space<vmem>>, vector<32x1xf32>
    %c0_i32 = arith.constant 0 : i32
    %c128_i32 = arith.constant 128 : i32
    %22 = arith.muli %c0_i32, %c128_i32 : i32
    %23 = tpu.assume_multiple %22, 128 : i32
    %c0_17 = arith.constant 0 : index
    %c0_18 = arith.constant 0 : index
    %24 = arith.index_cast %23 : i32 to index
    %25 = vector.load %arg1[%c0_17, %c0_18, %24] : memref<1x32x256xf32, #tpu.memory_space<vmem>>, vector<1x32x128xf32>
    %26 = vector.shape_cast %25 : vector<1x32x128xf32> to vector<32x128xf32>
    %27 = vector.broadcast %11 : vector<32x1xf32> to vector<32x128xf32>
    %28 = arith.subf %26, %27 : vector<32x128xf32>
    %29 = vector.broadcast %19 : vector<32x1xf32> to vector<32x128xf32>
    %30 = arith.mulf %28, %29 : vector<32x128xf32>
    %31 = arith.truncf %30 : vector<32x128xf32> to vector<32x128xbf16>
    %cst_19 = arith.constant dense<0.000000e+00> : vector<32x128xf32>
    %32 = tpu.matmul %20, %31, %cst_19 {dimension_numbers = #tpu.dot_dimension_numbers<[1], [0], [0], [1], [0, 0, 1, 1], [], []>} : vector<32x32xbf16>, vector<32x128xbf16>, vector<32x128xf32> -> vector<32x128xf32>
    %33 = arith.addf %26, %32 : vector<32x128xf32>
    %34 = vector.broadcast %21 : vector<32x1xf32> to vector<32x128xf32>
    %35 = arith.addf %33, %34 : vector<32x128xf32>
    %c0_20 = arith.constant 0 : index
    %c0_21 = arith.constant 0 : index
    %36 = arith.index_cast %23 : i32 to index
    %37 = vector.load %arg6[%c0_20, %c0_21, %36] : memref<1x32x256xf32, #tpu.memory_space<vmem>>, vector<1x32x128xf32>
    %38 = vector.shape_cast %37 : vector<1x32x128xf32> to vector<32x128xf32>
    %39 = vector.shape_cast %35 : vector<32x128xf32> to vector<1x32x128xf32>
    tpu.vector_store %arg6[%c0_20, %c0_21, %36], %39 {strides = array<i32>} : memref<1x32x256xf32, #tpu.memory_space<vmem>>, vector<1x32x128xf32>,
    %c1_i32 = arith.constant 1 : i32
    %c128_i32_22 = arith.constant 128 : i32
    %40 = arith.muli %c1_i32, %c128_i32_22 : i32
    %41 = tpu.assume_multiple %40, 128 : i32
    %c0_23 = arith.constant 0 : index
    %c0_24 = arith.constant 0 : index
    %42 = arith.index_cast %41 : i32 to index
    %43 = vector.load %arg1[%c0_23, %c0_24, %42] : memref<1x32x256xf32, #tpu.memory_space<vmem>>, vector<1x32x128xf32>
    %44 = vector.shape_cast %43 : vector<1x32x128xf32> to vector<32x128xf32>
    %45 = vector.broadcast %11 : vector<32x1xf32> to vector<32x128xf32>
    %46 = arith.subf %44, %45 : vector<32x128xf32>
    %47 = vector.broadcast %19 : vector<32x1xf32> to vector<32x128xf32>
    %48 = arith.mulf %46, %47 : vector<32x128xf32>
    %49 = arith.truncf %48 : vector<32x128xf32> to vector<32x128xbf16>
    %cst_25 = arith.constant dense<0.000000e+00> : vector<32x128xf32>
    %50 = tpu.matmul %20, %49, %cst_25 {dimension_numbers = #tpu.dot_dimension_numbers<[1], [0], [0], [1], [0, 0, 1, 1], [], []>} : vector<32x32xbf16>, vector<32x128xbf16>, vector<32x128xf32> -> vector<32x128xf32>
    %51 = arith.addf %44, %50 : vector<32x128xf32>
    %52 = vector.broadcast %21 : vector<32x1xf32> to vector<32x128xf32>
    %53 = arith.addf %51, %52 : vector<32x128xf32>
    %c0_26 = arith.constant 0 : index
    %c0_27 = arith.constant 0 : index
    %54 = arith.index_cast %41 : i32 to index
    %55 = vector.load %arg6[%c0_26, %c0_27, %54] : memref<1x32x256xf32, #tpu.memory_space<vmem>>, vector<1x32x128xf32>
    %56 = vector.shape_cast %55 : vector<1x32x128xf32> to vector<32x128xf32>
    %57 = vector.shape_cast %53 : vector<32x128xf32> to vector<1x32x128xf32>
    tpu.vector_store %arg6[%c0_26, %c0_27, %54], %57 {strides = array<i32>} : memref<1x32x256xf32, #tpu.memory_space<vmem>>, vector<1x32x128xf32>,
    %c2_i32 = arith.constant 2 : i32
    return
  }
  func.func @transform_0(%arg0: i32) -> (i32, i32, i32) {
    %c0_i32 = arith.constant 0 : i32
    %c0_i32_0 = arith.constant 0 : i32
    %c0_i32_1 = arith.constant 0 : i32
    return %arg0, %c0_i32, %c0_i32_0 : i32, i32, i32
  }
  func.func @transform_1(%arg0: i32) -> (i32, i32) {
    %c0_i32 = arith.constant 0 : i32
    %c0_i32_0 = arith.constant 0 : i32
    %c0_i32_1 = arith.constant 0 : i32
    return %c0_i32, %c0_i32_0 : i32, i32
  }
  func.func @transform_2(%arg0: i32) -> (i32, i32) {
    %c0_i32 = arith.constant 0 : i32
    %c0_i32_0 = arith.constant 0 : i32
    %c0_i32_1 = arith.constant 0 : i32
    return %c0_i32, %c0_i32_0 : i32, i32
  }
  func.func @transform_3(%arg0: i32) -> (i32, i32) {
    %c0_i32 = arith.constant 0 : i32
    %c0_i32_0 = arith.constant 0 : i32
    %c0_i32_1 = arith.constant 0 : i32
    return %c0_i32, %c0_i32_0 : i32, i32
  }
  func.func @transform_4(%arg0: i32) -> (i32, i32) {
    %c0_i32 = arith.constant 0 : i32
    %c0_i32_0 = arith.constant 0 : i32
    %c0_i32_1 = arith.constant 0 : i32
    return %c0_i32, %c0_i32_0 : i32, i32
  }
  func.func @transform_5(%arg0: i32) -> (i32, i32, i32) {
    %c0_i32 = arith.constant 0 : i32
    %c0_i32_0 = arith.constant 0 : i32
    %c0_i32_1 = arith.constant 0 : i32
    return %arg0, %c0_i32, %c0_i32_0 : i32, i32, i32
  }
}

module attributes {stable_mosaic.version = 11 : i64} {
  func.func @kernel(%arg0: i32, %arg1: memref<1x32x256xf32, #tpu.memory_space<vmem>>, %arg2: memref<32x32xf32, #tpu.memory_space<vmem>>, %arg3: memref<32x32xf32, #tpu.memory_space<vmem>>, %arg4: memref<32x32xbf16, #tpu.memory_space<vmem>>, %arg5: memref<32x1xf32, #tpu.memory_space<vmem>>, %arg6: memref<1x32x256xf32, #tpu.memory_space<vmem>>) attributes {dimension_semantics = [#tpu.dimension_semantics<parallel>], iteration_bounds = array<i64: 2>, scalar_prefetch = 0 : i64, scratch_operands = 0 : i64, tpu.core_type = #tpu.core_type<tc>, window_params = [{transform_indices = @transform_0, window_bounds = array<i64: 1, 32, 256>}, {pipeline_mode = #tpu.pipeline_mode<synchronous>, transform_indices = @transform_1, window_bounds = array<i64: 32, 32>}, {pipeline_mode = #tpu.pipeline_mode<synchronous>, transform_indices = @transform_2, window_bounds = array<i64: 32, 32>}, {pipeline_mode = #tpu.pipeline_mode<synchronous>, transform_indices = @transform_3, window_bounds = array<i64: 32, 32>}, {pipeline_mode = #tpu.pipeline_mode<synchronous>, transform_indices = @transform_4, window_bounds = array<i64: 32, 1>}, {transform_indices = @transform_5, window_bounds = array<i64: 1, 32, 256>}]} {
    %c0 = arith.constant 0 : index
    %c0_0 = arith.constant 0 : index
    %c0_1 = arith.constant 0 : index
    %0 = vector.load %arg1[%c0, %c0_0, %c0_1] : memref<1x32x256xf32, #tpu.memory_space<vmem>>, vector<1x32x256xf32>
    %1 = vector.shape_cast %0 : vector<1x32x256xf32> to vector<32x256xf32>
    %cst = arith.constant dense<0.000000e+00> : vector<32xf32>
    %2 = vector.multi_reduction <add>, %1, %cst [1] : vector<32x256xf32> to vector<32xf32>
    %3 = vector.shape_cast %2 : vector<32xf32> to vector<32x1xf32>
    %4 = arith.mulf %1, %1 : vector<32x256xf32>
    %cst_2 = arith.constant dense<0.000000e+00> : vector<32xf32>
    %5 = vector.multi_reduction <add>, %4, %cst_2 [1] : vector<32x256xf32> to vector<32xf32>
    %6 = vector.shape_cast %5 : vector<32xf32> to vector<32x1xf32>
    %c0_3 = arith.constant 0 : index
    %c0_4 = arith.constant 0 : index
    %7 = vector.load %arg2[%c0_3, %c0_4] : memref<32x32xf32, #tpu.memory_space<vmem>>, vector<32x32xf32>
    %c0_5 = arith.constant 0 : index
    %c0_6 = arith.constant 0 : index
    %8 = vector.load %arg3[%c0_5, %c0_6] : memref<32x32xf32, #tpu.memory_space<vmem>>, vector<32x32xf32>
    %cst_7 = arith.constant dense<0.000000e+00> : vector<32x1xf32>
    %9 = tpu.matmul %7, %3, %cst_7 {dimension_numbers = #tpu.dot_dimension_numbers<[1], [0], [0], [1], [0, 0, 1, 1], [], []>} : vector<32x32xf32>, vector<32x1xf32>, vector<32x1xf32> -> vector<32x1xf32>
    %cst_8 = arith.constant dense<0.000000e+00> : vector<32x1xf32>
    %10 = tpu.matmul %7, %6, %cst_8 {dimension_numbers = #tpu.dot_dimension_numbers<[1], [0], [0], [1], [0, 0, 1, 1], [], []>} : vector<32x32xf32>, vector<32x1xf32>, vector<32x1xf32> -> vector<32x1xf32>
    %cst_9 = arith.constant dense<0.000000e+00> : vector<32x1xf32>
    %11 = tpu.matmul %8, %9, %cst_9 {dimension_numbers = #tpu.dot_dimension_numbers<[1], [0], [0], [1], [0, 0, 1, 1], [], []>} : vector<32x32xf32>, vector<32x1xf32>, vector<32x1xf32> -> vector<32x1xf32>
    %cst_10 = arith.constant dense<0.000000e+00> : vector<32x1xf32>
    %12 = tpu.matmul %8, %10, %cst_10 {dimension_numbers = #tpu.dot_dimension_numbers<[1], [0], [0], [1], [0, 0, 1, 1], [], []>} : vector<32x32xf32>, vector<32x1xf32>, vector<32x1xf32> -> vector<32x1xf32>
    %13 = arith.mulf %11, %11 : vector<32x1xf32>
    %14 = arith.subf %12, %13 : vector<32x1xf32>
    %cst_11 = arith.constant 0.000000e+00 : f32
    %15 = vector.broadcast %cst_11 : f32 to vector<32x1xf32>
    %16 = arith.maximumf %14, %15 : vector<32x1xf32>
    %cst_12 = arith.constant 9.99999997E-7 : f32
    %17 = vector.broadcast %cst_12 : f32 to vector<32x1xf32>
    %18 = arith.addf %16, %17 : vector<32x1xf32>
    %19 = math.rsqrt %18 : vector<32x1xf32>
    %c0_13 = arith.constant 0 : index
    %c0_14 = arith.constant 0 : index
    %20 = vector.load %arg4[%c0_13, %c0_14] : memref<32x32xbf16, #tpu.memory_space<vmem>>, vector<32x32xbf16>
    %c0_15 = arith.constant 0 : index
    %c0_16 = arith.constant 0 : index
    %21 = vector.load %arg5[%c0_15, %c0_16] : memref<32x1xf32, #tpu.memory_space<vmem>>, vector<32x1xf32>
    %c0_i32 = arith.constant 0 : i32
    %c128_i32 = arith.constant 128 : i32
    %22 = arith.muli %c0_i32, %c128_i32 : i32
    %23 = tpu.assume_multiple %22, 128 : i32
    %c0_17 = arith.constant 0 : index
    %c0_18 = arith.constant 0 : index
    %24 = arith.index_cast %23 : i32 to index
    %25 = vector.load %arg1[%c0_17, %c0_18, %24] : memref<1x32x256xf32, #tpu.memory_space<vmem>>, vector<1x32x128xf32>
    %26 = vector.shape_cast %25 : vector<1x32x128xf32> to vector<32x128xf32>
    %27 = vector.broadcast %11 : vector<32x1xf32> to vector<32x128xf32>
    %28 = arith.subf %26, %27 : vector<32x128xf32>
    %29 = vector.broadcast %19 : vector<32x1xf32> to vector<32x128xf32>
    %30 = arith.mulf %28, %29 : vector<32x128xf32>
    %31 = arith.truncf %30 : vector<32x128xf32> to vector<32x128xbf16>
    %cst_19 = arith.constant dense<0.000000e+00> : vector<32x128xf32>
    %32 = tpu.matmul %20, %31, %cst_19 {dimension_numbers = #tpu.dot_dimension_numbers<[1], [0], [0], [1], [0, 0, 1, 1], [], []>} : vector<32x32xbf16>, vector<32x128xbf16>, vector<32x128xf32> -> vector<32x128xf32>
    %33 = arith.addf %26, %32 : vector<32x128xf32>
    %34 = vector.broadcast %21 : vector<32x1xf32> to vector<32x128xf32>
    %35 = arith.addf %33, %34 : vector<32x128xf32>
    %c0_20 = arith.constant 0 : index
    %c0_21 = arith.constant 0 : index
    %36 = arith.index_cast %23 : i32 to index
    %37 = vector.load %arg6[%c0_20, %c0_21, %36] : memref<1x32x256xf32, #tpu.memory_space<vmem>>, vector<1x32x128xf32>
    %38 = vector.shape_cast %37 : vector<1x32x128xf32> to vector<32x128xf32>
    %39 = vector.shape_cast %35 : vector<32x128xf32> to vector<1x32x128xf32>
    tpu.vector_store %arg6[%c0_20, %c0_21, %36], %39 {strides = array<i32>} : memref<1x32x256xf32, #tpu.memory_space<vmem>>, vector<1x32x128xf32>,
    %c1_i32 = arith.constant 1 : i32
    %c128_i32_22 = arith.constant 128 : i32
    %40 = arith.muli %c1_i32, %c128_i32_22 : i32
    %41 = tpu.assume_multiple %40, 128 : i32
    %c0_23 = arith.constant 0 : index
    %c0_24 = arith.constant 0 : index
    %42 = arith.index_cast %41 : i32 to index
    %43 = vector.load %arg1[%c0_23, %c0_24, %42] : memref<1x32x256xf32, #tpu.memory_space<vmem>>, vector<1x32x128xf32>
    %44 = vector.shape_cast %43 : vector<1x32x128xf32> to vector<32x128xf32>
    %45 = vector.broadcast %11 : vector<32x1xf32> to vector<32x128xf32>
    %46 = arith.subf %44, %45 : vector<32x128xf32>
    %47 = vector.broadcast %19 : vector<32x1xf32> to vector<32x128xf32>
    %48 = arith.mulf %46, %47 : vector<32x128xf32>
    %49 = arith.truncf %48 : vector<32x128xf32> to vector<32x128xbf16>
    %cst_25 = arith.constant dense<0.000000e+00> : vector<32x128xf32>
    %50 = tpu.matmul %20, %49, %cst_25 {dimension_numbers = #tpu.dot_dimension_numbers<[1], [0], [0], [1], [0, 0, 1, 1], [], []>} : vector<32x32xbf16>, vector<32x128xbf16>, vector<32x128xf32> -> vector<32x128xf32>
    %51 = arith.addf %44, %50 : vector<32x128xf32>
    %52 = vector.broadcast %21 : vector<32x1xf32> to vector<32x128xf32>
    %53 = arith.addf %51, %52 : vector<32x128xf32>
    %c0_26 = arith.constant 0 : index
    %c0_27 = arith.constant 0 : index
    %54 = arith.index_cast %41 : i32 to index
    %55 = vector.load %arg6[%c0_26, %c0_27, %54] : memref<1x32x256xf32, #tpu.memory_space<vmem>>, vector<1x32x128xf32>
    %56 = vector.shape_cast %55 : vector<1x32x128xf32> to vector<32x128xf32>
    %57 = vector.shape_cast %53 : vector<32x128xf32> to vector<1x32x128xf32>
    tpu.vector_store %arg6[%c0_26, %c0_27, %54], %57 {strides = array<i32>} : memref<1x32x256xf32, #tpu.memory_space<vmem>>, vector<1x32x128xf32>,
    %c2_i32 = arith.constant 2 : i32
    return
  }
  func.func @transform_0(%arg0: i32) -> (i32, i32, i32) {
    %c0_i32 = arith.constant 0 : i32
    %c0_i32_0 = arith.constant 0 : i32
    %c0_i32_1 = arith.constant 0 : i32
    return %arg0, %c0_i32, %c0_i32_0 : i32, i32, i32
  }
  func.func @transform_1(%arg0: i32) -> (i32, i32) {
    %c0_i32 = arith.constant 0 : i32
    %c0_i32_0 = arith.constant 0 : i32
    %c0_i32_1 = arith.constant 0 : i32
    return %c0_i32, %c0_i32_0 : i32, i32
  }
  func.func @transform_2(%arg0: i32) -> (i32, i32) {
    %c0_i32 = arith.constant 0 : i32
    %c0_i32_0 = arith.constant 0 : i32
    %c0_i32_1 = arith.constant 0 : i32
    return %c0_i32, %c0_i32_0 : i32, i32
  }
  func.func @transform_3(%arg0: i32) -> (i32, i32) {
    %c0_i32 = arith.constant 0 : i32
    %c0_i32_0 = arith.constant 0 : i32
    %c0_i32_1 = arith.constant 0 : i32
    return %c0_i32, %c0_i32_0 : i32, i32
  }
  func.func @transform_4(%arg0: i32) -> (i32, i32) {
    %c0_i32 = arith.constant 0 : i32
    %c0_i32_0 = arith.constant 0 : i32
    %c0_i32_1 = arith.constant 0 : i32
    return %c0_i32, %c0_i32_0 : i32, i32
  }
  func.func @transform_5(%arg0: i32) -> (i32, i32, i32) {
    %c0_i32 = arith.constant 0 : i32
    %c0_i32_0 = arith.constant 0 : i32
    %c0_i32_1 = arith.constant 0 : i32
    return %arg0, %c0_i32, %c0_i32_0 : i32, i32, i32
  }
}

</mosaic_0001>

<bundles_post_ra>
// kernel: tpu_custom_call.1
= control target key start
LH: loop header
LB: loop body
LE: loop exit
PB: predicated region body
PF: predicated region fallthrough
CT: control target
= control target key end

     0   :  { %10 = vsyncpa [#allocation3], 0  ;;  %s1628_s0 = inlined_call_operand.hbm [shape: f32[2,32,256], index: 0, kind: input, shape index: {}, may-alias: {0,5}]   ;;  %s1629_s1 = inlined_call_operand.vmem [shape: f32[32,32], index: 1, kind: input, shape index: {}]   ;;  %s1630_s2 = inlined_call_operand.vmem [shape: f32[32,32], index: 2, kind: input, shape index: {}]   ;;  %s1631_s3 = inlined_call_operand.vmem [shape: bf16[32,32], index: 3, kind: input, shape index: {}]   ;;  %s1632_s4 = inlined_call_operand.vmem [shape: f32[32,1], index: 4, kind: input, shape index: {}]   ;;  %s1633_s5 = inlined_call_operand.hbm [shape: f32[2,32,256], index: 5, kind: output, shape index: {}, may-alias: {0,5}]  }
   0x1   :  { %12 = vsyncpa [#allocation3 + $0x1], 0 }
   0x2   :  { %13 = vsyncpa [#allocation4], 0 }
   0x3   :  { %15 = vsyncpa [#allocation4 + $0x1], 0  ;;  %s1352_s18 = smov 0   ;;  %s1354_s19 = smov 0  }
   0x4   :  { %s1356_s20 = smov 0   ;;  %s1358_s21 = smov 0  }
   0x5 LB: > { %s1373_s22 = sadd.s32 4294967295, %s1313_s21   ;;  %s1000_s23 = sadd.s32 4294967294, %s1313_s21   ;;  %s1313_s21 = sphi %s1358_s21, %s1648_s21   ;;  %s1309_s20 = sphi %s1356_s20, %s1647_s20   ;;  %s1305_s19 = sphi %s1354_s19, %s1646_s19   ;;  %s1301_s18 = sphi %s1352_s18, %s1645_s18  }
   0x6   : > { %s1377_s24 = sadd.s32 1, %s1313_s21   ;;  %s28_s25 = sadd.s32 1, %s1309_s20 }
   0x7   : > { %s25_s26 = ssub.s32 %s1313_s21, %s1377_s24  ;;  %p35_p0 = scmp.ne.s32.totalorder %s1309_s20, %s1305_s19 }
   0x8   : > { %p26_p1 = scmp.eq.s32.totalorder %s25_s26, 0  ;;  %p36_p2 = scmp.eq.s32.totalorder %s1313_s21, 0 }
   0x9   : > { %p41_p3 = scmp.ne.s32.totalorder %s1305_s19, %s1301_s18  ;;  %p42_p4 = scmp.eq.s32.totalorder %s1373_s22, 0 }
   0xa   : > { %s1389_s27 = scalar_select %p26_p1, %s1309_s20, %s28_s25  }
   0xb   : > { %p1391_p5 = por %p36_p2, %p35_p0  ;;  %p1395_p6 = por %p42_p4, %p41_p3 }
   0xc   : > { %p149_p7 = scmp.eq.s32.totalorder %s1373_s22, 1  ;;  %p155_p8 = scmp.eq.s32.totalorder %s1000_s23, 1 }
   0xd   : > { %s1637_s29 = scalar_select %p1395_p6, 1, 0 }
   0xe   : > { %p1170_p10 = scmp.lt.s32.totalorder %s1313_s21, 2  ;;  %p1402_p11 = por %p149_p7, %p35_p0 }
   0xf   : > { %p1406_p12 = por %p155_p8, %p41_p3  ;;  %s187_s7 = sand.u32 1, %s1309_s20  }
  0x10   : > { %s1638_s30 = scalar_select %p1402_p11, 1, 0 }
  0x11   : > { %s1639_s6 = scalar_select %p1406_p12, 1, 0 }
  0x12   : > { %s1044_s8 = sshll.u32 %s1313_s21, 10  ;;  %s1003_s9 = sshll.u32 %s187_s7, 6 }
  0x13   : > { %s1415_s12 = scalar_lea.hbm %s1628_s0, %s1044_s8  ;;  %s191_s13 = scalar_lea.vmem [#allocation2], %s1003_s9 }
  0x14   : > { %s198_s14 = sshll.u32 %s191_s13, 4  ;;  %p1419_p13 = pnand %p1170_p10, %p1391_p5  ;;  %s1423_s14 = int_to_ptr.vmem [resolvable:$true] %s198_s14 }
  0x15   : > { %s1425_s16 = scalar_lea.sflag [#allocation3], %s187_s7  ;;  %s1221_s17 = scalar_lea.hbm %s1415_s12, 1024 }
  0x16   : > { %p1222_p0 = scmp.ne.s32.totalorder %s1415_s12, %s1221_s17  ;;  %p1223_p1 = pneg %p1419_p13 }
  0x17   : > { %s1226_s26 = scalar_lea.hbm %s1628_s0, 2048  ;;  %p1227_p4 = scmp.lt.s32.totalorder %s1415_s12, %s1628_s0 }
  0x18   : > { %p1224_p2 = pnand %p1223_p1, %p1222_p0  ;;  %p1228_p5 = scmp.lt.s32.totalorder %s1226_s26, %s1221_s17 }
  0x1a   : > { %p1225_p3 = pneg %p1224_p2  ;;  %p1229_p7 = por %p1228_p5, %p1227_p4 }
  0x1c   : > { %p1230_p8 = pnand %p1229_p7, %p1225_p3 }
  0x1e   : > { %1233 = shalt.err (!%p1230_p8)
}
  0x1f   : > { %s1234_s7 = scalar_lea.vmem %s1423_s14, 1024  ;;  %s1315_s9 = smov [#allocation2]  }
  0x20   : > { %p1235_p10 = scmp.ne.s32.totalorder %s1423_s14, %s1234_s7  ;;  %s1239_s10 = sshll.u32 %s1315_s9, 4  ;;  %s1240_s10 = int_to_ptr.vmem [resolvable:$false] %s1239_s10 }
  0x21   : > { %s1241_s11 = scalar_lea.vmem %s1240_s10, 2048  ;;  %p1242_p2 = scmp.lt.s32.totalorder %s1423_s14, %s1240_s10 }
  0x22   : > { %p1237_p9 = pnand %p1235_p10, %p1223_p1  ;;  %p1243_p12 = scmp.lt.s32.totalorder %s1241_s11, %s1234_s7 }
  0x24   : > { %p1238_p0 = pneg %p1237_p9  ;;  %p1244_p11 = por %p1243_p12, %p1242_p2 }
  0x26   : > { %p1245_p6 = pnand %p1244_p11, %p1238_p0 }
  0x28   : > { %1248 = shalt.err (!%p1245_p6)
}
  0x29   : > { %s1316_s13 = smov 256   ;;  %s1317_s17 = smov 16  }
  0x2a   : > { %1165 = dma.hbm_to_vmem [thread:$0]  (!%p1419_p13), %s1415_s12, 1024, %s1423_s14, %s1425_s16, %s1316_s13, %s1316_s13, %s1317_s17  }
  0x2b   : > { %p1006_p9 = scmp.ge.s32.totalorder %s1313_s21, 1  ;;  %p206_p1 = scmp.lt.s32.totalorder %s1313_s21, 3 }
  0x2d   : > { %p207_p3 = pnand %p1006_p9, %p206_p1 }
  0x2e   : > { %s1449_s23 = sand.u32 (!%p207_p3), 1, %s1305_s19   ;;  %p1641_p6 = scmp.ne.s32.totalorder (!%p207_p3), %s1637_s29, 0 }
  0x2f   : > { %210 = sbr.rel (%p207_p3) target bundleno = 991 (0x3df), region = 40  ;;  %s1007_s25 = sshll.u32 (!%p207_p3), %s1449_s23, 6 }
  0x30   : > { %s213_s26 = scalar_lea.sflag (!%p207_p3), [#allocation3], %s1449_s23  ;;  %s216_s28 = scalar_lea.vmem (!%p207_p3), [#allocation2], %s1007_s25 }
  0x34   : > { %1292 = dma.done.wait (%p1641_p6), %s213_s26, 1024  }
  0x35   : > { %1294 = vsyncadd (%p1641_p6), %s213_s26, 4294966272  ;;  %v1459_v0 = vld [vmem:[%s216_s28 + $0x30] sm:$0xff]  ;;  %v1461_v1 = vld [vmem:[%s216_s28 + $0x38] sm:$0xff]  ;;  %vm292_vm0 = vcmask 261120   ;;  %v1318_v48 = vmov 0   ;;  %s242_s29 = scalar_lea.vmem [#allocation5], %s1007_s25 }
  0x36   : > { %v1463_v2 = vld [vmem:[%s216_s28 + $0x10] sm:$0xff]  ;;  %v261_v3 = vadd.f32 %v1461_v1, %v1459_v0  ;;  %v270_v4 = vmul.f32 %v1459_v0, %v1459_v0  ;;  %v271_v5 = vmul.f32 %v1461_v1, %v1461_v1  ;;  %v1471_v6 = vld [vmem:[%s216_s28 + $0x18] sm:$0xff]  ;;  %v1473_v7 = vld [vmem:[%s216_s28 + $0x20] sm:$0xff]  ;;  %1210 = vset.pattern.permute.xlu1 %v1318_v48  ;;  %1209 = vset.pattern.permute.xlu0 %v1318_v48  ;;  %s927_s12 = sshll.u32 %s242_s29, 4  ;;  %s1045_s14 = sshll.u32 %s1373_s22, 10  ;;  %s1578_s12 = int_to_ptr.vmem [resolvable:$true] %s927_s12 }
  0x37   : > { %v1475_v8 = vld [vmem:[%s216_s28 + $0x28] sm:$0xff]  ;;  %v255_v9 = vadd.f32 %v1471_v6, %v1463_v2  ;;  %v268_v11 = vmul.f32 %v1473_v7, %v1473_v7  ;;  %v1485_v14 = vld [vmem:[%s216_s28] sm:$0xff]  ;;  %v266_v16 = vmul.f32 %v1463_v2, %v1463_v2  ;;  %v267_v17 = vmul.f32 %v1471_v6, %v1471_v6  ;;  %v286_v32 = vld [vmem:[%s1629_s1 + $0x10] sm:$0xff]  ;;  %s1585_s22 = scalar_lea.hbm %s1633_s5, %s1045_s14  ;;  %s914_s16 = scalar_lea.sflag [#allocation4], %s1449_s23 }
  0x38   : > { %262 = vadd.xlane.f32.xlu0 %v261_v3  ;;  %v258_v10 = vadd.f32 %v1475_v8, %v1473_v7  ;;  %v269_v12 = vmul.f32 %v1475_v8, %v1475_v8  ;;  %v281_v13 = vadd.f32 %v271_v5, %v270_v4  ;;  %v1487_v15 = vld [vmem:[%s216_s28 + $0x8] sm:$0xff]  ;;  %v264_v20 = vmul.f32 %v1485_v14, %v1485_v14  ;;  %v284_v24 = vld [vmem:[%s1629_s1] sm:$0xff]  ;;  %v287_v35 = vld [vmem:[%s1629_s1 + $0x18] sm:$0xff]  ;;  %s1249_s8 = scalar_lea.vmem %s1578_s12, 1024  ;;  %p1642_p12 = scmp.ne.s32.totalorder %s1638_s30, 0 }
  0x39   : > { %256 = vadd.xlane.f32.xlu1 %v255_v9  ;;  %v252_v19 = vadd.f32 %v1487_v15, %v1485_v14  ;;  %v265_v21 = vmul.f32 %v1487_v15, %v1487_v15  ;;  %v275_v22 = vadd.f32 %v267_v17, %v266_v16  ;;  %1094 = vmatprep.mubr.msk.f32.mxu0 %vm292_vm0, %v284_v24  ;;  %v285_v31 = vld [vmem:[%s1629_s1 + $0x8] sm:$0xff]  ;;  %v288_v36 = vld [vmem:[%s1630_s2] sm:$0xff]  ;;  %v290_v46 = vld [vmem:[%s1630_s2 + $0x10] sm:$0xff]  ;;  %p1250_p11 = scmp.ne.s32.totalorder %s1578_s12, %s1249_s8  ;;  %s1319_s7 = smov [#allocation5]  }
  0x3a   : > { %v278_v18 = vadd.f32 %v269_v12, %v268_v11  ;;  %1108 = vmatprep.mubr.msk.f32.mxu1 %vm292_vm0, %v284_v24  ;;  %v289_v44 = vld [vmem:[%s1630_s2 + $0x8] sm:$0xff]  ;;  %v291_v47 = vld [vmem:[%s1630_s2 + $0x18] sm:$0xff]  ;;  %v1211_v24 = vld [vmem:[%s1631_s3] sm:$0xff]   ;;  %s1253_s9 = sshll.u32 %s1319_s7, 4  ;;  %s1254_s9 = int_to_ptr.vmem [resolvable:$false] %s1253_s9 }
  0x3b   : > { %v272_v23 = vadd.f32 %v265_v21, %v264_v20  ;;  %v682_v59 = vld [vmem:[%s1632_s4 + $0x8] sm:$0xff]  ;;  %p1251_p13 = pnand %p1250_p11, %p1642_p12  ;;  %s1255_s10 = scalar_lea.vmem %s1254_s9, 2048 }
  0x3c   : > { %259 = vadd.xlane.f32.xlu0 %v258_v10  ;;  %v684_v10 = vld [vmem:[%s1632_s4 + $0x18] sm:$0xff]  ;;  %p1256_p5 = scmp.lt.s32.totalorder %s1578_s12, %s1254_s9  ;;  %p1257_p7 = scmp.lt.s32.totalorder %s1255_s10, %s1249_s8 }
  0x3d   : > { %282 = vadd.xlane.f32.xlu1 %v281_v13  ;;  %p1252_p4 = pneg %p1251_p13 }
  0x3e   : > { %p1258_p8 = por %p1257_p7, %p1256_p5 }
  0x40   : > { %279 = vadd.xlane.f32.xlu0 %v278_v18  ;;  %p1259_p10 = pnand %p1258_p8, %p1252_p4 }
  0x41   : > { %253 = vadd.xlane.f32.xlu1 %v252_v19 }
  0x44   : > { %276 = vadd.xlane.f32.xlu0 %v275_v22 }
  0x45   : > { %273 = vadd.xlane.f32.xlu1 %v272_v23  ;;  %v681_v23 = vld [vmem:[%s1632_s4] sm:$0xff] }
  0xc1   : > { %v263_v25 = vpop.xlane.xlu0 %262 }
  0xc2   : > { %v257_v26 = vpop.xlane.xlu1 %256  ;;  %1086 = vmatprep.subr.mxu0 %v263_v25 }
  0xc3   : > { %1087 = vmatpush3.msra.mxu0 %v263_v25  ;;  %v683_v25 = vld [vmem:[%s1632_s4 + $0x10] sm:$0xff] }
  0xc5   : > { %v260_v27 = vpop.xlane.xlu0 %259 }
  0xc6   : > { %v283_v28 = vpop.xlane.xlu1 %282  ;;  %1088 = vmatprep.subr.mxu0 %v260_v27 }
  0xc7   : > { %1089 = vmatpush3.msra.mxu0 %v260_v27  ;;  %1100 = vmatprep.subr.mxu1 %v283_v28 }
  0xc8   : > { %1090 = vmatprep.subr.mxu0 %v257_v26  ;;  %1101 = vmatpush3.msra.mxu1 %v283_v28 }
  0xc9   : > { %v280_v29 = vpop.xlane.xlu0 %279  ;;  %1091 = vmatpush3.msra.mxu0 %v257_v26 }
  0xca   : > { %v254_v30 = vpop.xlane.xlu1 %253  ;;  %1102 = vmatprep.subr.mxu1 %v280_v29 }
  0xcb   : > { %1092 = vmatprep.subr.mxu0 %v254_v30  ;;  %1103 = vmatpush3.msra.mxu1 %v280_v29 }
  0xcc   : > { %1093 = vmatpush3.msra.mxu0 %v254_v30 }
  0xcd   : > { %1095 = vmatmul.mubr.msk.f32.vlgmr.msra.gmra.mxu0 %vm292_vm0, %v285_v31  ;;  %v277_v33 = vpop.xlane.xlu0 %276 }
  0xce   : > { %1104 = vmatprep.subr.mxu1 %v277_v33  ;;  %1097 = vmatprep.mubr.msk.f32.mxu0 %vm292_vm0, %v286_v32  ;;  %v274_v34 = vpop.xlane.xlu1 %273 }
  0xcf   : > { %1105 = vmatpush3.msra.mxu1 %v277_v33 }
  0xd0   : > { %1106 = vmatprep.subr.mxu1 %v274_v34 }
  0xd1   : > { %1098 = vmatmul.mubr.msk.f32.gmra.mxu0 %vm292_vm0, %v287_v35  ;;  %1107 = vmatpush3.msra.mxu1 %v274_v34 }
  0xd2   : > { %1109 = vmatmul.mubr.msk.f32.vlgmr.msra.gmra.mxu1 %vm292_vm0, %v285_v31  ;;  %1122 = vmatprep.mubr.msk.f32.mxu0 %vm292_vm0, %v288_v36 }
  0xd3   : > { %1111 = vmatprep.mubr.msk.f32.mxu1 %vm292_vm0, %v286_v32 }
  0xd6   : > { %1112 = vmatmul.mubr.msk.f32.gmra.mxu1 %vm292_vm0, %v287_v35 }
  0xd7   : > { %1136 = vmatprep.mubr.msk.f32.mxu1 %vm292_vm0, %v288_v36 }
 0x18d   : > { %v1096_v37 = vpop.f32.mrf.mxu0 }
 0x18f   : > { %v371_v38 = vpop.f32.mrf.mxu0 }
 0x191   : > { %v1099_v39 = vpop.f32.mrf.mxu0 }
 0x192   : > { %1114 = vmatprep.subr.mxu0 %v1099_v39  ;;  %v1110_v40 = vpop.f32.mrf.mxu1 }
 0x193   : > { %v381_v41 = vpop.f32.mrf.mxu0  ;;  %1115 = vmatpush3.msra.mxu0 %v1099_v39 }
 0x194   : > { %1116 = vmatprep.subr.mxu0 %v381_v41  ;;  %v456_v42 = vpop.f32.mrf.mxu1 }
 0x195   : > { %1117 = vmatpush3.msra.mxu0 %v381_v41 }
 0x196   : > { %1118 = vmatprep.subr.mxu0 %v1096_v37  ;;  %v1113_v43 = vpop.f32.mrf.mxu1 }
 0x197   : > { %1119 = vmatpush3.msra.mxu0 %v1096_v37  ;;  %1128 = vmatprep.subr.mxu1 %v1113_v43 }
 0x198   : > { %1120 = vmatprep.subr.mxu0 %v371_v38  ;;  %v466_v45 = vpop.f32.mrf.mxu1  ;;  %1129 = vmatpush3.msra.mxu1 %v1113_v43 }
 0x199   : > { %1121 = vmatpush3.msra.mxu0 %v371_v38  ;;  %1130 = vmatprep.subr.mxu1 %v466_v45 }
 0x19a   : > { %1123 = vmatmul.mubr.msk.f32.vlgmr.msra.gmra.mxu0 %vm292_vm0, %v289_v44  ;;  %1131 = vmatpush3.msra.mxu1 %v466_v45 }
 0x19b   : > { %1132 = vmatprep.subr.mxu1 %v1110_v40  ;;  %1125 = vmatprep.mubr.msk.f32.mxu0 %vm292_vm0, %v290_v46 }
 0x19c   : > { %1133 = vmatpush3.msra.mxu1 %v1110_v40 }
 0x19d   : > { %1134 = vmatprep.subr.mxu1 %v456_v42 }
 0x19e   : > { %1126 = vmatmul.mubr.msk.f32.gmra.mxu0 %vm292_vm0, %v291_v47  ;;  %1135 = vmatpush3.msra.mxu1 %v456_v42 }
 0x19f   : > { %1137 = vmatmul.mubr.msk.f32.vlgmr.msra.gmra.mxu1 %vm292_vm0, %v289_v44  ;;  %1146 = vmatprep.mubr.msk.bf16.mxu0 %vm292_vm0, %v1211_v24 }
 0x1a0   : > { %1139 = vmatprep.mubr.msk.f32.mxu1 %vm292_vm0, %v290_v46 }
 0x1a3   : > { %1140 = vmatmul.mubr.msk.f32.gmra.mxu1 %vm292_vm0, %v291_v47 }
 0x1a4   : > { %1154 = vmatprep.mubr.msk.bf16.mxu1 %vm292_vm0, %v1211_v24 }
 0x25a   : > { %v1124_v49 = vpop.f32.mrf.mxu0 }
 0x25b   : > { %v658_v61 = vmul.f32 %v1124_v49, %v1124_v49 }
 0x25c   : > { %v553_v50 = vpop.f32.mrf.mxu0 }
 0x25d   : > { %v657_v53 = vmul.f32 %v553_v50, %v553_v50 }
 0x25e   : > { %v1127_v51 = vpop.f32.mrf.mxu0 }
 0x25f   : > { %706 = vperm.xlu1 %1210, %v1127_v51   ;;  %v1138_v52 = vpop.f32.mrf.mxu1  ;;  %v660_v54 = vmul.f32 %v1127_v51, %v1127_v51 }
 0x260   : > { %v563_v55 = vpop.f32.mrf.mxu0  ;;  %v662_v11 = vsub.f32 %v1138_v52, %v658_v61 }
 0x261   : > { %v638_v56 = vpop.f32.mrf.mxu1  ;;  %701 = vperm.xlu0 %1209, %v563_v55   ;;  %v659_v58 = vmul.f32 %v563_v55, %v563_v55 }
 0x262   : > { %v661_v57 = vsub.f32 %v638_v56, %v657_v53  ;;  %v666_v16 = vmax.f32 %v662_v11, 0.0 }
 0x263   : > { %691 = vperm.xlu1 %1210, %v553_v50   ;;  %v1141_v60 = vpop.f32.mrf.mxu1 }
 0x264   : > { %v665_v62 = vmax.f32 %v661_v57, 0.0  ;;  %v664_v63 = vsub.f32 %v1141_v60, %v660_v54  ;;  %v670_v18 = vadd.f32 1e-06, %v666_v16  ;;  %v1212_v54 = vld [vmem:[%s1631_s3 + $0x8] sm:$0xff]  }
 0x265   : > { %v648_v3 = vpop.f32.mrf.mxu1  ;;  %815 = vperm.xlu0 %1209, %v682_v59  }
 0x266   : > { %v669_v4 = vadd.f32 1e-06, %v665_v62  ;;  %v668_v5 = vmax.f32 %v664_v63, 0.0  ;;  %v663_v9 = vsub.f32 %v648_v3, %v659_v58 }
 0x267   : > { %696 = vperm.xlu1 %1210, %v1124_v49  }
 0x268   : > { %1213 = vrsqrt.f32 %v669_v4  ;;  %v672_v12 = vadd.f32 1e-06, %v668_v5  ;;  %v667_v13 = vmax.f32 %v663_v9, 0.0 }
 0x269   : > { %825 = vperm.xlu0 %1209, %v684_v10  }
 0x26a   : > { %1215 = vrsqrt.f32 %v672_v12  ;;  %v671_v17 = vadd.f32 1e-06, %v667_v13 }
 0x26c   : > { %1217 = vrsqrt.f32 %v671_v17 }
 0x26d   : > { %1219 = vrsqrt.f32 %v670_v18 }
 0x275   : > { %v1214_v19 = vpop.eup %1213 }
 0x276   : > { %715 = vperm.xlu1 %1210, %v1214_v19  }
 0x277   : > { %v1216_v20 = vpop.eup %1215 }
 0x279   : > { %v1218_v21 = vpop.eup %1217 }
 0x27a   : > { %730 = vperm.xlu1 %1210, %v1216_v20   ;;  %v1220_v22 = vpop.eup %1219 }
 0x27e   : > { %725 = vperm.xlu1 %1210, %v1218_v21  }
 0x282   : > { %720 = vperm.xlu1 %1210, %v1220_v22  }
 0x286   : > { %810 = vperm.xlu1 %1210, %v681_v23  }
 0x28a   : > { %820 = vperm.xlu1 %1210, %v683_v25  }
 0x2da   : > { %v707_v26 = vpop.permute.xlu1 %706 }
 0x2db   : > { %v712_v32 = vsub.f32 %v1459_v0, %v707_v26  ;;  %v844_v33 = vsub.f32 %v1461_v1, %v707_v26 }
 0x2dc   : > { %v702_v30 = vpop.permute.xlu0 %701 }
 0x2dd   : > { %v711_v34 = vsub.f32 %v1473_v7, %v702_v30  ;;  %v843_v35 = vsub.f32 %v1475_v8, %v702_v30 }
 0x2de   : > { %v692_v27 = vpop.permute.xlu1 %691 }
 0x2df   : > { %v709_v41 = vsub.f32 %v1485_v14, %v692_v27  ;;  %v841_v42 = vsub.f32 %v1487_v15, %v692_v27 }
 0x2e0   : > { %v816_v56 = vpop.permute.xlu0 %815 }
 0x2e2   : > { %v697_v28 = vpop.permute.xlu1 %696 }
 0x2e3   : > { %v710_v43 = vsub.f32 %v1463_v2, %v697_v28  ;;  %v842_v44 = vsub.f32 %v1471_v6, %v697_v28 }
 0x2e4   : > { %v826_v12 = vpop.permute.xlu0 %825 }
 0x2f1   : > { %v716_v29 = vpop.permute.xlu1 %715 }
 0x2f2   : > { %v733_v47 = vmul.f32 %v716_v29, %v709_v41  ;;  %v845_v49 = vmul.f32 %v841_v42, %v716_v29 }
 0x2f5   : > { %v731_v31 = vpop.permute.xlu1 %730 }
 0x2f6   : > { %v736_v37 = vmul.f32 %v731_v31, %v712_v32  ;;  %v848_v38 = vmul.f32 %v844_v33, %v731_v31 }
 0x2f9   : > { %v726_v36 = vpop.permute.xlu1 %725 }
 0x2fa   : > { %v735_v39 = vmul.f32 %v726_v36, %v711_v34  ;;  %v847_v40 = vmul.f32 %v843_v35, %v726_v36 }
 0x2fc   : > { %v738_v45 = vpack.c.bf16 %v736_v37, %v735_v39  ;;  %v850_v46 = vpack.c.bf16 %v848_v38, %v847_v40 }
 0x2fd   : > { %v721_v48 = vpop.permute.xlu1 %720 }
 0x2fe   : > { %v734_v50 = vmul.f32 %v721_v48, %v710_v43  ;;  %v846_v51 = vmul.f32 %v842_v44, %v721_v48  ;;  %1142 = vmatprep.subr.bf16.mxu0 %v738_v45  ;;  %1150 = vmatprep.subr.bf16.mxu1 %v850_v46 }
 0x2ff   : > { %1143 = vmatpush3.bf16.msra.mxu0 %v738_v45  ;;  %1151 = vmatpush3.bf16.msra.mxu1 %v850_v46 }
 0x300   : > { %v737_v52 = vpack.c.bf16 %v734_v50, %v733_v47  ;;  %v849_v53 = vpack.c.bf16 %v846_v51, %v845_v49 }
 0x301   : > { %v811_v55 = vpop.permute.xlu1 %810 }
 0x302   : > { %1144 = vmatprep.subr.bf16.mxu0 %v737_v52  ;;  %1152 = vmatprep.subr.bf16.mxu1 %v849_v53 }
 0x303   : > { %1145 = vmatpush3.bf16.msra.mxu0 %v737_v52  ;;  %1153 = vmatpush3.bf16.msra.mxu1 %v849_v53 }
 0x305   : > { %v821_v59 = vpop.permute.xlu1 %820 }
 0x306   : > { %1147 = vmatmul.mubr.msk.bf16.vlgmr.msra.gmra.mxu0 %vm292_vm0, %v1212_v54  ;;  %1155 = vmatmul.mubr.msk.bf16.vlgmr.msra.gmra.mxu1 %vm292_vm0, %v1212_v54 }
 0x3c6   : > { %v1148_v57 = vpop.f32.mrf.mxu0  ;;  %v1156_v58 = vpop.f32.mrf.mxu1 }
 0x3c7   : > { %v806_v60 = vadd.f32 %v1148_v57, %v1473_v7  ;;  %v902_v61 = vadd.f32 %v1156_v58, %v1475_v8 }
 0x3c8   : > { %v789_v62 = vpop.f32.mrf.mxu0  ;;  %v885_v63 = vpop.f32.mrf.mxu1 }
 0x3c9   : > { %v830_v3 = vadd.f32 %v821_v59, %v806_v60  ;;  %v906_v4 = vadd.f32 %v902_v61, %v821_v59  ;;  %v804_v5 = vadd.f32 %v789_v62, %v1485_v14  ;;  %v900_v9 = vadd.f32 %v885_v63, %v1487_v15 }
 0x3ca   : > { %v1149_v10 = vpop.f32.mrf.mxu0  ;;  %v1157_v11 = vpop.f32.mrf.mxu1 }
 0x3cb   : > { %834 = vst [vmem:[%s242_s29 + $0x20] sm:$0xff] %v830_v3  ;;  %1037 = vst [vmem:[%s242_s29 + $0x28] sm:$0xff] %v906_v4  ;;  %v828_v7 = vadd.f32 %v811_v55, %v804_v5  ;;  %v904_v13 = vadd.f32 %v900_v9, %v811_v55  ;;  %v807_v8 = vadd.f32 %v1149_v10, %v1459_v0 }
 0x3cc   : > { %v903_v16 = vadd.f32 %v1157_v11, %v1461_v1  ;;  %v792_v17 = vpop.f32.mrf.mxu0  ;;  %v888_v14 = vpop.f32.mrf.mxu1 }
 0x3cd   : > { %832 = vst [vmem:[%s242_s29] sm:$0xff] %v828_v7  ;;  %1035 = vst [vmem:[%s242_s29 + $0x8] sm:$0xff] %v904_v13  ;;  %v831_v15 = vadd.f32 %v826_v12, %v807_v8  ;;  %v805_v19 = vadd.f32 %v792_v17, %v1463_v2  ;;  %v901_v20 = vadd.f32 %v888_v14, %v1471_v6 }
 0x3ce   : > { %v907_v18 = vadd.f32 %v903_v16, %v826_v12 }
 0x3cf   : > { %835 = vst [vmem:[%s242_s29 + $0x30] sm:$0xff] %v831_v15  ;;  %v829_v0 = vadd.f32 %v816_v56, %v805_v19  ;;  %v905_v1 = vadd.f32 %v901_v20, %v816_v56 }
 0x3d0   : > { %1038 = vst [vmem:[%s242_s29 + $0x38] sm:$0xff] %v907_v18 }
 0x3d1   : > { %833 = vst [vmem:[%s242_s29 + $0x10] sm:$0xff] %v829_v0  ;;  %1036 = vst [vmem:[%s242_s29 + $0x18] sm:$0xff] %v905_v1 }
 0x3d2   : > { %1262 = shalt.err (!%p1259_p10)
}
 0x3d3   : > { %s1263_s11 = scalar_lea.hbm %s1585_s22, 1024  ;;  %s1267_s26 = scalar_lea.hbm %s1633_s5, 2048 }
 0x3d4   : > { %p1264_p0 = scmp.ne.s32.totalorder %s1585_s22, %s1263_s11  ;;  %p1268_p1 = scmp.lt.s32.totalorder %s1585_s22, %s1633_s5 }
 0x3d5   : > { %p1269_p3 = scmp.lt.s32.totalorder %s1267_s26, %s1263_s11 }
 0x3d6   : > { %p1265_p2 = pnand %p1264_p0, %p1642_p12 }
 0x3d7   : > { %p1270_p6 = por %p1269_p3, %p1268_p1 }
 0x3d8   : > { %p1266_p9 = pneg %p1265_p2 }
 0x3da   : > { %p1271_p11 = pnand %p1270_p6, %p1266_p9 }
 0x3dc   : > { %1274 = shalt.err (!%p1271_p11)
}
 0x3dd   : > { %s1320_s14 = smov 256   ;;  %s1321_s25 = smov 16  }
 0x3de   : > { %1160 = dma.vmem_to_hbm [thread:$0]  (%p1642_p12), %s1578_s12, 1024, %s1585_s22, %s914_s16, %s1320_s14, %s1320_s14, %s1321_s25  }
 0x3df PF: > { %s942_s15 = sand.u32 1, %s1301_s18   ;;  %p1643_p13 = scmp.ne.s32.totalorder %s1639_s6, 0 }
 0x3e0   : > { %p1644_p4 = scmp.ge.s32.totalorder %s1313_s21, 2  ;;  %s943_s8 = scalar_lea.sflag [#allocation4], %s942_s15 }
 0x3e2   : > { %p1167_p5 = pnand %p1644_p4, %p1643_p13 }
 0x3e4   : > { %p1168_p7 = pneg %p1167_p5 }
 0x3e6   : > { %1296 = dma.done.wait (%p1168_p7), %s943_s8, 1024  }
 0x3e7   : > { %1298 = vsyncadd (%p1168_p7), %s943_s8, 4294966272  ;;  %p18_p8 = scmp.ge.s32.totalorder %s1377_s24, 4   ;;  %s1645_s18 = smov %s1305_s19 }
 0x3e8   : > { %s1646_s19 = smov %s1309_s20  ;;  %s1647_s20 = smov %s1389_s27 }
 0x3e9   : > { %s1648_s21 = smov %s1377_s24  ;;  %20 = sbr.rel (!%p18_p8) target bundleno = 5 (0x5), region = 87 }
 0x3ee   :  { %948 = vsyncpa [#allocation3], 1 }
 0x3ef   :  { %950 = vsyncpa [#allocation3 + $0x1], 1 }
 0x3f0   :  { %951 = vsyncpa [#allocation4], 1 }
 0x3f1   :  { %953 = vsyncpa [#allocation4 + $0x1], 1 }

// kernel: tpu_custom_call.1
= control target key start
LH: loop header
LB: loop body
LE: loop exit
PB: predicated region body
PF: predicated region fallthrough
CT: control target
= control target key end

     0   :  { %10 = vsyncpa [#allocation3], 0  ;;  %s1783_s0 = inlined_call_operand.hbm [shape: f32[2,32,256], index: 0, kind: input, shape index: {}]   ;;  %s1784_s1 = inlined_call_operand.vmem [shape: f32[32,32], index: 1, kind: input, shape index: {}]   ;;  %s1785_s2 = inlined_call_operand.hbm [shape: f32[32,32], index: 2, kind: input, shape index: {}]   ;;  %s1786_s3 = inlined_call_operand.hbm [shape: bf16[32,32], index: 3, kind: input, shape index: {}]   ;;  %s1787_s4 = inlined_call_operand.vmem [shape: f32[32,1], index: 4, kind: input, shape index: {}]   ;;  %s1788_s5 = inlined_call_operand.hbm [shape: f32[2,32,256], index: 5, kind: output, shape index: {}]  }
   0x1   :  { %12 = vsyncpa [#allocation3 + $0x1], 0 }
   0x2   :  { %13 = vsyncpa [#allocation6], 0 }
   0x3   :  { %14 = vsyncpa [#allocation4], 0 }
   0x4   :  { %16 = vsyncpa [#allocation4 + $0x1], 0  ;;  %s1491_s18 = smov 0   ;;  %s1493_s19 = smov 0  }
   0x5   :  { %s1495_s20 = smov 0   ;;  %s1497_s21 = smov 0  }
   0x6 LB: > { %s1512_s22 = sadd.s32 4294967295, %s1446_s21   ;;  %s1048_s23 = sadd.s32 4294967294, %s1446_s21   ;;  %s1446_s21 = sphi %s1497_s21, %s1810_s21   ;;  %s1442_s20 = sphi %s1495_s20, %s1809_s20   ;;  %s1438_s19 = sphi %s1493_s19, %s1808_s19   ;;  %s1434_s18 = sphi %s1491_s18, %s1807_s18  }
   0x7   : > { %p42_p0 = scmp.ne.s32.totalorder %s1438_s19, %s1434_s18  ;;  %p1789_p1 = scmp.eq.s32.totalorder %s1512_s22, 0 }
   0x8   : > { %p156_p3 = scmp.eq.s32.totalorder %s1048_s23, 1  ;;  %p1049_p5 = scmp.ge.s32.totalorder %s1446_s21, 1 }
   0x9   : > { %p1521_p4 = por %p1789_p1, %p42_p0  ;;  %p163_p7 = scmp.lt.s32.totalorder %s1446_s21, 3 }
   0xa   : > { %p1526_p6 = por %p156_p3, %p42_p0  ;;  %s1448_s27 = smov [#allocation5]  }
   0xb   : > { %s1793_s24 = scalar_select %p1521_p4, 1, 0 }
   0xc   : > { %s1794_s25 = scalar_select %p1526_p6, 1, 0 }
   0xd   : > { %p1531_p8 = pnand %p1049_p5, %p163_p7  ;;  %s178_s28 = sshll.u32 %s1448_s27, 4  ;;  %s179_s28 = int_to_ptr.vmem [resolvable:$true] %s178_s28 }
   0xe   : > { %s1449_s30 = smov [#allocation7]   ;;  %s1309_s7 = scalar_lea.vmem %s179_s28, 512 }
   0xf   : > { %s1795_s26 = scalar_select %p1531_p8, 1, 0 }
  0x10   : > { %p1222_p9 = pneg %p1531_p8  ;;  %s191_s6 = sshll.u32 %s1449_s30, 4  ;;  %s192_s6 = int_to_ptr.vmem [resolvable:$true] %s191_s6 }
  0x11   : > { %p1310_p13 = scmp.ne.s32.totalorder %s179_s28, %s1309_s7  ;;  %p1317_p5 = scmp.lt.s32.totalorder %s179_s28, %s179_s28 }
  0x12   : > { %p1540_p11 = pnand %p1222_p9, %p1789_p1  ;;  %p1318_p7 = scmp.lt.s32.totalorder %s1309_s7, %s1309_s7 }
  0x14   : > { %p1300_p12 = pneg %p1540_p11  ;;  %p1319_p10 = por %p1318_p7, %p1317_p5 }
  0x16   : > { %p1312_p0 = pnand %p1310_p13, %p1300_p12 }
  0x18   : > { %p1313_p3 = pneg %p1312_p0 }
  0x1a   : > { %p1320_p9 = pnand %p1319_p10, %p1313_p3 }
  0x1c   : > { %1323 = shalt.err (!%p1320_p9)
}
  0x1d   : > { %s1450_s8 = smov 128   ;;  %s1451_s9 = smov 8  }
  0x1e   : > { %1225 = dma.hbm_to_vmem [thread:$0]  (!%p1540_p11), %s1785_s2, 512, %s179_s28, [#allocation6], %s1450_s8, %s1450_s8, %s1451_s9  }
  0x1f   : > { %s1335_s12 = scalar_lea.vmem %s192_s6, 256  ;;  %p1343_p2 = scmp.lt.s32.totalorder %s192_s6, %s192_s6 }
  0x20   : > { %p1336_p1 = scmp.ne.s32.totalorder %s192_s6, %s1335_s12  ;;  %p1344_p6 = scmp.lt.s32.totalorder %s1335_s12, %s1335_s12 }
  0x22   : > { %p1338_p13 = pnand %p1336_p1, %p1300_p12  ;;  %p1345_p5 = por %p1344_p6, %p1343_p2 }
  0x24   : > { %p1339_p0 = pneg %p1338_p13 }
  0x26   : > { %p1346_p10 = pnand %p1345_p5, %p1339_p0 }
  0x28   : > { %1349 = shalt.err (!%p1346_p10)
}
  0x29   : > { %s1452_s13 = smov 64   ;;  %s1453_s14 = smov 4  }
  0x2a   : > { %1228 = dma.hbm_to_vmem [thread:$0]  (!%p1540_p11), %s1786_s3, 256, %s192_s6, [#allocation6], %s1452_s13, %s1452_s13, %s1453_s14  }
  0x2b   : > { %s1563_s17 = sadd.s32 1, %s1446_s21   ;;  %s29_s27 = sadd.s32 1, %s1442_s20 }
  0x2c   : > { %s26_s23 = ssub.s32 %s1446_s21, %s1563_s17  ;;  %p36_p2 = scmp.ne.s32.totalorder %s1442_s20, %s1438_s19 }
  0x2d   : > { %p27_p1 = scmp.eq.s32.totalorder %s26_s23, 0  ;;  %p37_p6 = scmp.eq.s32.totalorder %s1446_s21, 0 }
  0x2e   : > { %p1797_p3 = scmp.eq.s32.totalorder %s1512_s22, 1  ;;  %p1239_p9 = scmp.lt.s32.totalorder %s1446_s21, 2 }
  0x2f   : > { %s1572_s28 = scalar_select %p27_p1, %s1442_s20, %s29_s27  }
  0x30   : > { %p38_p12 = por %p37_p6, %p36_p2  ;;  %p1576_p7 = por %p1797_p3, %p36_p2 }
  0x31   : > { %s208_s29 = sand.u32 1, %s1442_s20   ;;  %s1096_s6 = sshll.u32 %s1446_s21, 10 }
  0x32   : > { %s1798_s30 = scalar_select %p1576_p7, 1, 0 }
  0x33   : > { %s1053_s7 = sshll.u32 %s208_s29, 6  ;;  %s1586_s10 = scalar_lea.hbm %s1783_s0, %s1096_s6 }
  0x34   : > { %s212_s11 = scalar_lea.vmem [#allocation2], %s1053_s7  ;;  %p1590_p11 = pnand %p1239_p9, %p38_p12 }
  0x35   : > { %s219_s12 = sshll.u32 %s212_s11, 4  ;;  %s1594_s14 = scalar_lea.sflag [#allocation3], %s208_s29  ;;  %s1588_s12 = int_to_ptr.vmem [resolvable:$true] %s219_s12 }
  0x36   : > { %s1350_s15 = scalar_lea.hbm %s1586_s10, 1024  ;;  %p1352_p0 = pneg %p1590_p11 }
  0x37   : > { %p1351_p13 = scmp.ne.s32.totalorder %s1586_s10, %s1350_s15  ;;  %s1355_s27 = scalar_lea.hbm %s1783_s0, 2048 }
  0x38   : > { %p1356_p1 = scmp.lt.s32.totalorder %s1586_s10, %s1783_s0  ;;  %p1357_p2 = scmp.lt.s32.totalorder %s1355_s27, %s1350_s15 }
  0x39   : > { %p1353_p5 = pnand %p1352_p0, %p1351_p13 }
  0x3a   : > { %p1358_p6 = por %p1357_p2, %p1356_p1 }
  0x3b   : > { %p1354_p10 = pneg %p1353_p5 }
  0x3d   : > { %p1359_p12 = pnand %p1358_p6, %p1354_p10 }
  0x3f   : > { %1362 = shalt.err (!%p1359_p12)
}
  0x40   : > { %s1363_s29 = scalar_lea.vmem %s1588_s12, 1024  ;;  %s1454_s8 = smov [#allocation2]  }
  0x41   : > { %p1364_p3 = scmp.ne.s32.totalorder %s1588_s12, %s1363_s29  ;;  %s1368_s9 = sshll.u32 %s1454_s8, 4  ;;  %s1369_s9 = int_to_ptr.vmem [resolvable:$false] %s1368_s9 }
  0x42   : > { %s1370_s11 = scalar_lea.vmem %s1369_s9, 2048  ;;  %p1371_p5 = scmp.lt.s32.totalorder %s1588_s12, %s1369_s9 }
  0x43   : > { %p1366_p9 = pnand %p1364_p3, %p1352_p0  ;;  %p1372_p7 = scmp.lt.s32.totalorder %s1370_s11, %s1363_s29 }
  0x45   : > { %p1367_p13 = pneg %p1366_p9  ;;  %p1373_p4 = por %p1372_p7, %p1371_p5 }
  0x47   : > { %p1374_p8 = pnand %p1373_p4, %p1367_p13 }
  0x49   : > { %1377 = shalt.err (!%p1374_p8)
}
  0x4a   : > { %s1455_s15 = smov 256   ;;  %s1456_s16 = smov 16  }
  0x4b   : > { %1232 = dma.hbm_to_vmem [thread:$0]  (!%p1590_p11), %s1586_s10, 1024, %s1588_s12, %s1594_s14, %s1455_s15, %s1455_s15, %s1456_s16  }
  0x4c   : > { %p1800_p0 = scmp.ne.s32.totalorder %s1795_s26, 0 }
  0x4d   : > { %s1618_s23 = sand.u32 (!%p1800_p0), 1, %s1438_s19   ;;  %p1801_p4 = scmp.ne.s32.totalorder (!%p1800_p0), %s1793_s24, 0 }
  0x4e   : > { %231 = sbr.rel (%p1800_p0) target bundleno = 1025 (0x401), region = 40  ;;  %s1057_s27 = sshll.u32 (!%p1800_p0), %s1618_s23, 6 }
  0x4f   : > { %s234_s7 = scalar_lea.sflag (!%p1800_p0), [#allocation3], %s1618_s23  ;;  %s237_s6 = scalar_lea.vmem (!%p1800_p0), [#allocation2], %s1057_s27 }
  0x53   : > { %1421 = dma.done.wait (%p1801_p4), %s234_s7, 1024  }
  0x54   : > { %1423 = vsyncadd (%p1801_p4), %s234_s7, 4294966272  ;;  %p1802_p8 = scmp.eq.s32.totalorder %s1512_s22, 0 }
  0x56   : > { %1425 = dma.done.wait (%p1802_p8), [#allocation6], 768   ;;  %p1803_p7 = pmov %p1802_p8 }
  0x57   : > { %v1632_v0 = vld [vmem:[%s237_s6 + $0x30] sm:$0xff]  ;;  %v1634_v1 = vld [vmem:[%s237_s6 + $0x38] sm:$0xff]  ;;  %v1646_v7 = vld [vmem:[%s237_s6 + $0x20] sm:$0xff]  ;;  %vm321_vm0 = vcmask 261120   ;;  %v1457_v48 = vmov 0   ;;  %s271_s10 = scalar_lea.vmem [#allocation8], %s1057_s27 }
  0x58   : > { %1427 = vsyncadd (%p1803_p7), [#allocation6], 4294966528  ;;  %v1636_v2 = vld [vmem:[%s237_s6 + $0x10] sm:$0xff]  ;;  %v290_v3 = vadd.f32 %v1634_v1, %v1632_v0  ;;  %v299_v4 = vmul.f32 %v1632_v0, %v1632_v0  ;;  %v300_v5 = vmul.f32 %v1634_v1, %v1634_v1  ;;  %v1644_v6 = vld [vmem:[%s237_s6 + $0x18] sm:$0xff]  ;;  %v297_v11 = vmul.f32 %v1646_v7, %v1646_v7  ;;  %1287 = vset.pattern.permute.xlu1 %v1457_v48  ;;  %s956_s12 = sshll.u32 %s271_s10, 4  ;;  %s1097_s13 = sshll.u32 %s1512_s22, 10  ;;  %s1733_s12 = int_to_ptr.vmem [resolvable:$true] %s956_s12 }
  0x59   : > { %v1648_v8 = vld [vmem:[%s237_s6 + $0x28] sm:$0xff]  ;;  %v284_v9 = vadd.f32 %v1644_v6, %v1636_v2  ;;  %v1658_v14 = vld [vmem:[%s237_s6] sm:$0xff]  ;;  %v295_v16 = vmul.f32 %v1636_v2, %v1636_v2  ;;  %v296_v17 = vmul.f32 %v1644_v6, %v1644_v6  ;;  %v315_v32 = vld [vmem:[%s1784_s1 + $0x10] sm:$0xff]  ;;  %1286 = vset.pattern.permute.xlu0 %v1457_v48  ;;  %s1740_s22 = scalar_lea.hbm %s1788_s5, %s1097_s13  ;;  %s943_s29 = scalar_lea.sflag [#allocation4], %s1618_s23 }
  0x5a   : > { %291 = vadd.xlane.f32.xlu0 %v290_v3  ;;  %v287_v10 = vadd.f32 %v1648_v8, %v1646_v7  ;;  %v298_v12 = vmul.f32 %v1648_v8, %v1648_v8  ;;  %v310_v13 = vadd.f32 %v300_v5, %v299_v4  ;;  %v1660_v15 = vld [vmem:[%s237_s6 + $0x8] sm:$0xff]  ;;  %v293_v20 = vmul.f32 %v1658_v14, %v1658_v14  ;;  %v313_v24 = vld [vmem:[%s1784_s1] sm:$0xff]  ;;  %v316_v35 = vld [vmem:[%s1784_s1 + $0x18] sm:$0xff]  ;;  %s1378_s8 = scalar_lea.vmem %s1733_s12, 1024  ;;  %p1804_p10 = scmp.ne.s32.totalorder %s1798_s30, 0 }
  0x5b   : > { %285 = vadd.xlane.f32.xlu1 %v284_v9  ;;  %v281_v19 = vadd.f32 %v1660_v15, %v1658_v14  ;;  %v294_v21 = vmul.f32 %v1660_v15, %v1660_v15  ;;  %v304_v22 = vadd.f32 %v296_v17, %v295_v16  ;;  %1146 = vmatprep.mubr.msk.f32.mxu0 %vm321_vm0, %v313_v24  ;;  %v314_v31 = vld [vmem:[%s1784_s1 + $0x8] sm:$0xff]  ;;  %v317_v36 = vld [vmem:[#allocation5] sm:$0xff]  ;;  %v319_v46 = vld [vmem:[#allocation5 + $0x10] sm:$0xff]  ;;  %p1379_p11 = scmp.ne.s32.totalorder %s1733_s12, %s1378_s8  ;;  %s1458_s9 = smov [#allocation8]  }
  0x5c   : > { %v307_v18 = vadd.f32 %v298_v12, %v297_v11  ;;  %1160 = vmatprep.mubr.msk.f32.mxu1 %vm321_vm0, %v313_v24  ;;  %v318_v44 = vld [vmem:[#allocation5 + $0x8] sm:$0xff]  ;;  %v320_v47 = vld [vmem:[#allocation5 + $0x18] sm:$0xff]  ;;  %v1288_v24 = vld [vmem:[#allocation7] sm:$0xff]   ;;  %s1382_s11 = sshll.u32 %s1458_s9, 4  ;;  %s1383_s11 = int_to_ptr.vmem [resolvable:$false] %s1382_s11 }
  0x5d   : > { %v301_v23 = vadd.f32 %v294_v21, %v293_v20  ;;  %v711_v59 = vld [vmem:[%s1787_s4 + $0x8] sm:$0xff]  ;;  %p1380_p1 = pnand %p1379_p11, %p1804_p10  ;;  %s1384_s15 = scalar_lea.vmem %s1383_s11, 2048 }
  0x5e   : > { %288 = vadd.xlane.f32.xlu0 %v287_v10  ;;  %v713_v10 = vld [vmem:[%s1787_s4 + $0x18] sm:$0xff]  ;;  %p1385_p6 = scmp.lt.s32.totalorder %s1733_s12, %s1383_s11  ;;  %p1386_p12 = scmp.lt.s32.totalorder %s1384_s15, %s1378_s8 }
  0x5f   : > { %311 = vadd.xlane.f32.xlu1 %v310_v13  ;;  %p1381_p2 = pneg %p1380_p1 }
  0x60   : > { %p1387_p3 = por %p1386_p12, %p1385_p6 }
  0x62   : > { %308 = vadd.xlane.f32.xlu0 %v307_v18  ;;  %p1388_p9 = pnand %p1387_p3, %p1381_p2 }
  0x63   : > { %282 = vadd.xlane.f32.xlu1 %v281_v19 }
  0x66   : > { %305 = vadd.xlane.f32.xlu0 %v304_v22 }
  0x67   : > { %302 = vadd.xlane.f32.xlu1 %v301_v23  ;;  %v710_v23 = vld [vmem:[%s1787_s4] sm:$0xff] }
  0xe3   : > { %v292_v25 = vpop.xlane.xlu0 %291 }
  0xe4   : > { %v286_v26 = vpop.xlane.xlu1 %285  ;;  %1138 = vmatprep.subr.mxu0 %v292_v25 }
  0xe5   : > { %1139 = vmatpush3.msra.mxu0 %v292_v25  ;;  %v712_v25 = vld [vmem:[%s1787_s4 + $0x10] sm:$0xff] }
  0xe7   : > { %v289_v27 = vpop.xlane.xlu0 %288 }
  0xe8   : > { %v312_v28 = vpop.xlane.xlu1 %311  ;;  %1140 = vmatprep.subr.mxu0 %v289_v27 }
  0xe9   : > { %1141 = vmatpush3.msra.mxu0 %v289_v27  ;;  %1152 = vmatprep.subr.mxu1 %v312_v28 }
  0xea   : > { %1142 = vmatprep.subr.mxu0 %v286_v26  ;;  %1153 = vmatpush3.msra.mxu1 %v312_v28 }
  0xeb   : > { %v309_v29 = vpop.xlane.xlu0 %308  ;;  %1143 = vmatpush3.msra.mxu0 %v286_v26 }
  0xec   : > { %v283_v30 = vpop.xlane.xlu1 %282  ;;  %1154 = vmatprep.subr.mxu1 %v309_v29 }
  0xed   : > { %1144 = vmatprep.subr.mxu0 %v283_v30  ;;  %1155 = vmatpush3.msra.mxu1 %v309_v29 }
  0xee   : > { %1145 = vmatpush3.msra.mxu0 %v283_v30 }
  0xef   : > { %1147 = vmatmul.mubr.msk.f32.vlgmr.msra.gmra.mxu0 %vm321_vm0, %v314_v31  ;;  %v306_v33 = vpop.xlane.xlu0 %305 }
  0xf0   : > { %1156 = vmatprep.subr.mxu1 %v306_v33  ;;  %1149 = vmatprep.mubr.msk.f32.mxu0 %vm321_vm0, %v315_v32  ;;  %v303_v34 = vpop.xlane.xlu1 %302 }
  0xf1   : > { %1157 = vmatpush3.msra.mxu1 %v306_v33 }
  0xf2   : > { %1158 = vmatprep.subr.mxu1 %v303_v34 }
  0xf3   : > { %1150 = vmatmul.mubr.msk.f32.gmra.mxu0 %vm321_vm0, %v316_v35  ;;  %1159 = vmatpush3.msra.mxu1 %v303_v34 }
  0xf4   : > { %1161 = vmatmul.mubr.msk.f32.vlgmr.msra.gmra.mxu1 %vm321_vm0, %v314_v31  ;;  %1174 = vmatprep.mubr.msk.f32.mxu0 %vm321_vm0, %v317_v36 }
  0xf5   : > { %1163 = vmatprep.mubr.msk.f32.mxu1 %vm321_vm0, %v315_v32 }
  0xf8   : > { %1164 = vmatmul.mubr.msk.f32.gmra.mxu1 %vm321_vm0, %v316_v35 }
  0xf9   : > { %1188 = vmatprep.mubr.msk.f32.mxu1 %vm321_vm0, %v317_v36 }
 0x1af   : > { %v1148_v37 = vpop.f32.mrf.mxu0 }
 0x1b1   : > { %v400_v38 = vpop.f32.mrf.mxu0 }
 0x1b3   : > { %v1151_v39 = vpop.f32.mrf.mxu0 }
 0x1b4   : > { %1166 = vmatprep.subr.mxu0 %v1151_v39  ;;  %v1162_v40 = vpop.f32.mrf.mxu1 }
 0x1b5   : > { %v410_v41 = vpop.f32.mrf.mxu0  ;;  %1167 = vmatpush3.msra.mxu0 %v1151_v39 }
 0x1b6   : > { %1168 = vmatprep.subr.mxu0 %v410_v41  ;;  %v485_v42 = vpop.f32.mrf.mxu1 }
 0x1b7   : > { %1169 = vmatpush3.msra.mxu0 %v410_v41 }
 0x1b8   : > { %1170 = vmatprep.subr.mxu0 %v1148_v37  ;;  %v1165_v43 = vpop.f32.mrf.mxu1 }
 0x1b9   : > { %1171 = vmatpush3.msra.mxu0 %v1148_v37  ;;  %1180 = vmatprep.subr.mxu1 %v1165_v43 }
 0x1ba   : > { %1172 = vmatprep.subr.mxu0 %v400_v38  ;;  %v495_v45 = vpop.f32.mrf.mxu1  ;;  %1181 = vmatpush3.msra.mxu1 %v1165_v43 }
 0x1bb   : > { %1173 = vmatpush3.msra.mxu0 %v400_v38  ;;  %1182 = vmatprep.subr.mxu1 %v495_v45 }
 0x1bc   : > { %1175 = vmatmul.mubr.msk.f32.vlgmr.msra.gmra.mxu0 %vm321_vm0, %v318_v44  ;;  %1183 = vmatpush3.msra.mxu1 %v495_v45 }
 0x1bd   : > { %1184 = vmatprep.subr.mxu1 %v1162_v40  ;;  %1177 = vmatprep.mubr.msk.f32.mxu0 %vm321_vm0, %v319_v46 }
 0x1be   : > { %1185 = vmatpush3.msra.mxu1 %v1162_v40 }
 0x1bf   : > { %1186 = vmatprep.subr.mxu1 %v485_v42 }
 0x1c0   : > { %1178 = vmatmul.mubr.msk.f32.gmra.mxu0 %vm321_vm0, %v320_v47  ;;  %1187 = vmatpush3.msra.mxu1 %v485_v42 }
 0x1c1   : > { %1189 = vmatmul.mubr.msk.f32.vlgmr.msra.gmra.mxu1 %vm321_vm0, %v318_v44  ;;  %1198 = vmatprep.mubr.msk.bf16.mxu0 %vm321_vm0, %v1288_v24 }
 0x1c2   : > { %1191 = vmatprep.mubr.msk.f32.mxu1 %vm321_vm0, %v319_v46 }
 0x1c5   : > { %1192 = vmatmul.mubr.msk.f32.gmra.mxu1 %vm321_vm0, %v320_v47 }
 0x1c6   : > { %1206 = vmatprep.mubr.msk.bf16.mxu1 %vm321_vm0, %v1288_v24 }
 0x27c   : > { %v1176_v49 = vpop.f32.mrf.mxu0 }
 0x27d   : > { %v687_v61 = vmul.f32 %v1176_v49, %v1176_v49 }
 0x27e   : > { %v582_v50 = vpop.f32.mrf.mxu0 }
 0x27f   : > { %v686_v53 = vmul.f32 %v582_v50, %v582_v50 }
 0x280   : > { %v1179_v51 = vpop.f32.mrf.mxu0 }
 0x281   : > { %735 = vperm.xlu1 %1287, %v1179_v51   ;;  %v1190_v52 = vpop.f32.mrf.mxu1  ;;  %v689_v54 = vmul.f32 %v1179_v51, %v1179_v51 }
 0x282   : > { %v592_v55 = vpop.f32.mrf.mxu0  ;;  %v691_v11 = vsub.f32 %v1190_v52, %v687_v61 }
 0x283   : > { %v667_v56 = vpop.f32.mrf.mxu1  ;;  %730 = vperm.xlu0 %1286, %v592_v55   ;;  %v688_v58 = vmul.f32 %v592_v55, %v592_v55 }
 0x284   : > { %v690_v57 = vsub.f32 %v667_v56, %v686_v53  ;;  %v695_v16 = vmax.f32 %v691_v11, 0.0 }
 0x285   : > { %720 = vperm.xlu1 %1287, %v582_v50   ;;  %v1193_v60 = vpop.f32.mrf.mxu1 }
 0x286   : > { %v694_v62 = vmax.f32 %v690_v57, 0.0  ;;  %v693_v63 = vsub.f32 %v1193_v60, %v689_v54  ;;  %v699_v18 = vadd.f32 1e-06, %v695_v16  ;;  %v1289_v54 = vld [vmem:[#allocation7 + $0x8] sm:$0xff]  }
 0x287   : > { %v677_v3 = vpop.f32.mrf.mxu1  ;;  %844 = vperm.xlu0 %1286, %v711_v59  }
 0x288   : > { %v698_v4 = vadd.f32 1e-06, %v694_v62  ;;  %v697_v5 = vmax.f32 %v693_v63, 0.0  ;;  %v692_v9 = vsub.f32 %v677_v3, %v688_v58 }
 0x289   : > { %725 = vperm.xlu1 %1287, %v1176_v49  }
 0x28a   : > { %1290 = vrsqrt.f32 %v698_v4  ;;  %v701_v12 = vadd.f32 1e-06, %v697_v5  ;;  %v696_v13 = vmax.f32 %v692_v9, 0.0 }
 0x28b   : > { %854 = vperm.xlu0 %1286, %v713_v10  }
 0x28c   : > { %1292 = vrsqrt.f32 %v701_v12  ;;  %v700_v17 = vadd.f32 1e-06, %v696_v13 }
 0x28e   : > { %1294 = vrsqrt.f32 %v700_v17 }
 0x28f   : > { %1296 = vrsqrt.f32 %v699_v18 }
 0x297   : > { %v1291_v19 = vpop.eup %1290 }
 0x298   : > { %744 = vperm.xlu1 %1287, %v1291_v19  }
 0x299   : > { %v1293_v20 = vpop.eup %1292 }
 0x29b   : > { %v1295_v21 = vpop.eup %1294 }
 0x29c   : > { %759 = vperm.xlu1 %1287, %v1293_v20   ;;  %v1297_v22 = vpop.eup %1296 }
 0x2a0   : > { %754 = vperm.xlu1 %1287, %v1295_v21  }
 0x2a4   : > { %749 = vperm.xlu1 %1287, %v1297_v22  }
 0x2a8   : > { %839 = vperm.xlu1 %1287, %v710_v23  }
 0x2ac   : > { %849 = vperm.xlu1 %1287, %v712_v25  }
 0x2fc   : > { %v736_v26 = vpop.permute.xlu1 %735 }
 0x2fd   : > { %v741_v32 = vsub.f32 %v1632_v0, %v736_v26  ;;  %v873_v33 = vsub.f32 %v1634_v1, %v736_v26 }
 0x2fe   : > { %v731_v30 = vpop.permute.xlu0 %730 }
 0x2ff   : > { %v740_v34 = vsub.f32 %v1646_v7, %v731_v30  ;;  %v872_v35 = vsub.f32 %v1648_v8, %v731_v30 }
 0x300   : > { %v721_v27 = vpop.permute.xlu1 %720 }
 0x301   : > { %v738_v41 = vsub.f32 %v1658_v14, %v721_v27  ;;  %v870_v42 = vsub.f32 %v1660_v15, %v721_v27 }
 0x302   : > { %v845_v56 = vpop.permute.xlu0 %844 }
 0x304   : > { %v726_v28 = vpop.permute.xlu1 %725 }
 0x305   : > { %v739_v43 = vsub.f32 %v1636_v2, %v726_v28  ;;  %v871_v44 = vsub.f32 %v1644_v6, %v726_v28 }
 0x306   : > { %v855_v12 = vpop.permute.xlu0 %854 }
 0x313   : > { %v745_v29 = vpop.permute.xlu1 %744 }
 0x314   : > { %v762_v47 = vmul.f32 %v745_v29, %v738_v41  ;;  %v874_v49 = vmul.f32 %v870_v42, %v745_v29 }
 0x317   : > { %v760_v31 = vpop.permute.xlu1 %759 }
 0x318   : > { %v765_v37 = vmul.f32 %v760_v31, %v741_v32  ;;  %v877_v38 = vmul.f32 %v873_v33, %v760_v31 }
 0x31b   : > { %v755_v36 = vpop.permute.xlu1 %754 }
 0x31c   : > { %v764_v39 = vmul.f32 %v755_v36, %v740_v34  ;;  %v876_v40 = vmul.f32 %v872_v35, %v755_v36 }
 0x31e   : > { %v767_v45 = vpack.c.bf16 %v765_v37, %v764_v39  ;;  %v879_v46 = vpack.c.bf16 %v877_v38, %v876_v40 }
 0x31f   : > { %v750_v48 = vpop.permute.xlu1 %749 }
 0x320   : > { %v763_v50 = vmul.f32 %v750_v48, %v739_v43  ;;  %v875_v51 = vmul.f32 %v871_v44, %v750_v48  ;;  %1194 = vmatprep.subr.bf16.mxu0 %v767_v45  ;;  %1202 = vmatprep.subr.bf16.mxu1 %v879_v46 }
 0x321   : > { %1195 = vmatpush3.bf16.msra.mxu0 %v767_v45  ;;  %1203 = vmatpush3.bf16.msra.mxu1 %v879_v46 }
 0x322   : > { %v766_v52 = vpack.c.bf16 %v763_v50, %v762_v47  ;;  %v878_v53 = vpack.c.bf16 %v875_v51, %v874_v49 }
 0x323   : > { %v840_v55 = vpop.permute.xlu1 %839 }
 0x324   : > { %1196 = vmatprep.subr.bf16.mxu0 %v766_v52  ;;  %1204 = vmatprep.subr.bf16.mxu1 %v878_v53 }
 0x325   : > { %1197 = vmatpush3.bf16.msra.mxu0 %v766_v52  ;;  %1205 = vmatpush3.bf16.msra.mxu1 %v878_v53 }
 0x327   : > { %v850_v59 = vpop.permute.xlu1 %849 }
 0x328   : > { %1199 = vmatmul.mubr.msk.bf16.vlgmr.msra.gmra.mxu0 %vm321_vm0, %v1289_v54  ;;  %1207 = vmatmul.mubr.msk.bf16.vlgmr.msra.gmra.mxu1 %vm321_vm0, %v1289_v54 }
 0x3e8   : > { %v1200_v57 = vpop.f32.mrf.mxu0  ;;  %v1208_v58 = vpop.f32.mrf.mxu1 }
 0x3e9   : > { %v835_v60 = vadd.f32 %v1200_v57, %v1646_v7  ;;  %v931_v61 = vadd.f32 %v1208_v58, %v1648_v8 }
 0x3ea   : > { %v818_v62 = vpop.f32.mrf.mxu0  ;;  %v914_v63 = vpop.f32.mrf.mxu1 }
 0x3eb   : > { %v859_v3 = vadd.f32 %v850_v59, %v835_v60  ;;  %v935_v4 = vadd.f32 %v931_v61, %v850_v59  ;;  %v833_v5 = vadd.f32 %v818_v62, %v1658_v14  ;;  %v929_v9 = vadd.f32 %v914_v63, %v1660_v15 }
 0x3ec   : > { %v1201_v10 = vpop.f32.mrf.mxu0  ;;  %v1209_v11 = vpop.f32.mrf.mxu1 }
 0x3ed   : > { %863 = vst [vmem:[%s271_s10 + $0x20] sm:$0xff] %v859_v3  ;;  %1089 = vst [vmem:[%s271_s10 + $0x28] sm:$0xff] %v935_v4  ;;  %v857_v7 = vadd.f32 %v840_v55, %v833_v5  ;;  %v933_v13 = vadd.f32 %v929_v9, %v840_v55  ;;  %v836_v8 = vadd.f32 %v1201_v10, %v1632_v0 }
 0x3ee   : > { %v932_v16 = vadd.f32 %v1209_v11, %v1634_v1  ;;  %v821_v17 = vpop.f32.mrf.mxu0  ;;  %v917_v14 = vpop.f32.mrf.mxu1 }
 0x3ef   : > { %861 = vst [vmem:[%s271_s10] sm:$0xff] %v857_v7  ;;  %1087 = vst [vmem:[%s271_s10 + $0x8] sm:$0xff] %v933_v13  ;;  %v860_v15 = vadd.f32 %v855_v12, %v836_v8  ;;  %v834_v19 = vadd.f32 %v821_v17, %v1636_v2  ;;  %v930_v20 = vadd.f32 %v917_v14, %v1644_v6 }
 0x3f0   : > { %v936_v18 = vadd.f32 %v932_v16, %v855_v12 }
 0x3f1   : > { %864 = vst [vmem:[%s271_s10 + $0x30] sm:$0xff] %v860_v15  ;;  %v858_v0 = vadd.f32 %v845_v56, %v834_v19  ;;  %v934_v1 = vadd.f32 %v930_v20, %v845_v56 }
 0x3f2   : > { %1090 = vst [vmem:[%s271_s10 + $0x38] sm:$0xff] %v936_v18 }
 0x3f3   : > { %862 = vst [vmem:[%s271_s10 + $0x10] sm:$0xff] %v858_v0  ;;  %1088 = vst [vmem:[%s271_s10 + $0x18] sm:$0xff] %v934_v1 }
 0x3f4   : > { %1391 = shalt.err (!%p1388_p9)
}
 0x3f5   : > { %s1392_s16 = scalar_lea.hbm %s1740_s22, 1024  ;;  %s1396_s24 = scalar_lea.hbm %s1788_s5, 2048 }
 0x3f6   : > { %p1393_p13 = scmp.ne.s32.totalorder %s1740_s22, %s1392_s16  ;;  %p1397_p4 = scmp.lt.s32.totalorder %s1740_s22, %s1788_s5 }
 0x3f7   : > { %p1398_p8 = scmp.lt.s32.totalorder %s1396_s24, %s1392_s16 }
 0x3f8   : > { %p1394_p5 = pnand %p1393_p13, %p1804_p10 }
 0x3f9   : > { %p1399_p7 = por %p1398_p8, %p1397_p4 }
 0x3fa   : > { %p1395_p0 = pneg %p1394_p5 }
 0x3fc   : > { %p1400_p11 = pnand %p1399_p7, %p1395_p0 }
 0x3fe   : > { %1403 = shalt.err (!%p1400_p11)
}
 0x3ff   : > { %s1459_s13 = smov 256   ;;  %s1460_s27 = smov 16  }
 0x400   : > { %1220 = dma.vmem_to_hbm [thread:$0]  (%p1804_p10), %s1733_s12, 1024, %s1740_s22, %s943_s29, %s1459_s13, %s1459_s13, %s1460_s27  }
 0x401 PF: > { %s971_s14 = sand.u32 1, %s1434_s18   ;;  %p1805_p1 = scmp.ne.s32.totalorder %s1794_s25, 0 }
 0x402   : > { %p1806_p2 = scmp.ge.s32.totalorder %s1446_s21, 2  ;;  %s972_s8 = scalar_lea.sflag [#allocation4], %s971_s14 }
 0x404   : > { %p1234_p6 = pnand %p1806_p2, %p1805_p1 }
 0x406   : > { %p1235_p12 = pneg %p1234_p6 }
 0x408   : > { %1429 = dma.done.wait (%p1235_p12), %s972_s8, 1024  }
 0x409   : > { %1431 = vsyncadd (%p1235_p12), %s972_s8, 4294966272  ;;  %p19_p3 = scmp.ge.s32.totalorder %s1563_s17, 4   ;;  %s1807_s18 = smov %s1438_s19 }
 0x40a   : > { %s1808_s19 = smov %s1442_s20  ;;  %s1809_s20 = smov %s1572_s28 }
 0x40b   : > { %s1810_s21 = smov %s1563_s17  ;;  %21 = sbr.rel (!%p19_p3) target bundleno = 6 (0x6), region = 95 }
 0x410   :  { %977 = vsyncpa [#allocation3], 1 }
 0x411   :  { %979 = vsyncpa [#allocation3 + $0x1], 1 }
 0x412   :  { %980 = vsyncpa [#allocation6], 1 }
 0x413   :  { %981 = vsyncpa [#allocation4], 1 }
 0x414   :  { %983 = vsyncpa [#allocation4 + $0x1], 1 }

</bundles_post_ra>
